<compile_context>
chip_gen: v6e
topology: v6e:2x2x1
jax: 0.10.0
libtpu: 0.0.40
codegen_flags: <defaults>
</compile_context>

<pallas_src>
import functools

import jax
import jax.numpy as jnp
from jax.experimental import pallas as pl
from jax.experimental.pallas import tpu as pltpu

LN_EPS = 1e-5


def _layer_norm(v, w, b):
    mean = jnp.mean(v, axis=-1, keepdims=True)
    var = jnp.mean((v - mean) ** 2, axis=-1, keepdims=True)
    return (v - mean) * jax.lax.rsqrt(var + LN_EPS) * w + b


def _encoder_layer_kernel(num_heads, q_block,
                          amask_ref, pad_ref, x_ref,
                          wq_ref, bq_ref, wkv_ref, bkv_ref, wo_ref, bo_ref,
                          ln1w_ref, ln1b_ref,
                          w1_ref, b1_ref, w2_ref, b2_ref,
                          ln2w_ref, ln2b_ref,
                          o_ref,
                          kh_ref, vh_ref):
    qi = pl.program_id(1)
    H = num_heads
    tq = q_block
    S = x_ref.shape[1]
    E = x_ref.shape[2]
    Dh = E // H
    cdt = x_ref.dtype
    f32 = jnp.float32

    # ---- K/V projection for the whole sequence, once per batch element ------
    # x_ref has a constant block index over the query axis, so it stays
    # resident in VMEM for all tq-steps of this batch element.
    @pl.when(qi == 0)
    def _():
        xs = x_ref[0]                                                    # (S, E) cdt
        kv = jnp.dot(xs, wkv_ref[...],
                     preferred_element_type=f32) + bkv_ref[...]          # (S, 2E) f32
        kvh = jnp.transpose(kv.reshape(S, 2 * H, Dh), (1, 0, 2)).astype(cdt)   # (2H,S,Dh)
        kh_ref[...] = kvh[:H]
        vh_ref[...] = kvh[H:]

    # ---- Q projection for this query tile (1/sqrt(Dh) folded into wq/bq) ----
    row0 = pl.multiple_of(qi * tq, tq)
    xq = x_ref[0, pl.ds(row0, tq), :]                                    # (tq, E) cdt
    q = jnp.dot(xq, wq_ref[...], preferred_element_type=f32) + bq_ref[...]     # (tq,E) f32
    qh = jnp.transpose(q.reshape(tq, H, Dh), (1, 0, 2)).astype(cdt)      # (H, tq, Dh)

    # ---- head-batched attention scores + softmax (f32) -----------------------
    s = jnp.einsum('hqd,hkd->hqk', qh, kh_ref[...],
                   preferred_element_type=f32)                           # (H, tq, S)
    # additive attn mask (-1e8) tile + additive key-padding row (-1e9)
    s = s + amask_ref[...] + pad_ref[0]
    m = jnp.max(s, axis=-1, keepdims=True)
    p = jnp.exp(s - m)
    p = p * pl.reciprocal(jnp.sum(p, axis=-1, keepdims=True), approx=True)

    ctx = jnp.einsum('hqk,hkd->hqd', p.astype(cdt), vh_ref[...],
                     preferred_element_type=f32).astype(cdt)             # (H, tq, Dh)

    # ---- out-projection fused with the head "transpose": sum_h ctx[h]@Wo[h] --
    # (no (H,tq,Dh)->(tq,E) XLU relayout; H is a small static constant)
    attn = jnp.dot(ctx[0], wo_ref[0], preferred_element_type=f32)
    for h in range(1, H):
        attn = attn + jnp.dot(ctx[h], wo_ref[h], preferred_element_type=f32)
    attn = attn + bo_ref[...]                                            # (tq, E) f32

    # ---- dropout == identity (eval); residual; post-LN; FFN; residual; LN ----
    y1 = _layer_norm(xq.astype(f32) + attn, ln1w_ref[...], ln1b_ref[...])
    hdn = jnp.dot(y1.astype(cdt), w1_ref[...],
                  preferred_element_type=f32) + b1_ref[...]
    hdn = jnp.maximum(hdn, 0.0)
    ffn = jnp.dot(hdn.astype(cdt), w2_ref[...],
                  preferred_element_type=f32) + b2_ref[...]
    y2 = _layer_norm(y1 + ffn, ln2w_ref[...], ln2b_ref[...])

    o_ref[0] = y2.astype(o_ref.dtype)


def pack_params(params, num_heads, compute_dtype=jnp.bfloat16):
    """One-time packing of fairseq-layout weights into kernel layout.

    nn.Linear weights (out,in) -> (in,out); matmul operands cast to
    compute_dtype (biases / LN params stay f32); attention scale folded into
    the q projection; K/V fused into one (E,2E) matmul; out-proj weight packed
    as (H, Dh, E).  Call once at model-load time, NOT per forward.
    """
    f32 = jnp.float32
    cdt = compute_dtype
    E = params["q_weight"].shape[0]
    H = num_heads
    assert E % H == 0, "embed_dim must be divisible by num_heads"
    Dh = E // H
    scale = Dh ** -0.5

    def t(w):                            # (out,in) -> (in,out)
        return jnp.asarray(w, f32).T

    def b2d(b):
        return jnp.asarray(b, f32).reshape(1, -1)

    return {
        "wq": (t(params["q_weight"]) * scale).astype(cdt),               # (E, E)
        "bq": b2d(params["q_bias"]) * scale,                             # (1, E)
        "wkv": jnp.concatenate([t(params["k_weight"]), t(params["v_weight"])],
                               axis=1).astype(cdt),                      # (E, 2E)
        "bkv": jnp.concatenate([b2d(params["k_bias"]), b2d(params["v_bias"])],
                               axis=1),                                  # (1, 2E)
        "wo": t(params["out_weight"]).reshape(H, Dh, E).astype(cdt),     # (H, Dh, E)
        "bo": b2d(params["out_bias"]),
        "w1": t(params["fc1_weight"]).astype(cdt),                       # (E, F)
        "b1": b2d(params["fc1_bias"]),
        "w2": t(params["fc2_weight"]).astype(cdt),                       # (F, E)
        "b2": b2d(params["fc2_bias"]),
        "ln1w": b2d(params["ln1_weight"]), "ln1b": b2d(params["ln1_bias"]),
        "ln2w": b2d(params["ln2_weight"]), "ln2b": b2d(params["ln2_bias"]),
    }


def _derive_vmem_limit(weight_arrays, S, E, F, H, tq, compute_dtype):
    """Generation-agnostic VMEM budget derived from actual buffer sizes."""
    cb = jnp.dtype(compute_dtype).itemsize
    wbytes = sum(int(a.size) * a.dtype.itemsize for a in weight_arrays)
    # pipelined blocks: x (resident per batch), attn-mask tile, pad row, out tile
    blk = S * E * cb + tq * S * 4 + S * 4 + tq * E * cb
    scratch = 2 * H * S * (E // H) * cb                 # resident K/V heads
    # rough bound on live f32 intermediates (scores, probs, projections, FFN)
    live = 3 * H * tq * S * 4 + S * 2 * E * 4 + tq * (2 * E + F) * 4
    # weights are double-buffered by the pipeline (constant index => fetched once).
    # TODO(synk): pl.Buffered(1) on the weight specs would drop the factor 2.
    total = 2 * wbytes + 2 * blk + scratch + live
    total = int(total * 1.25) + (4 << 20)               # compiler/spill headroom
    return max(16 << 20, min(total, 96 << 20))


def context_encoder_layer(x_sbe, encoder_padding_mask, attn_mask, packed,
                          num_heads, q_block=None, compute_dtype=jnp.bfloat16):
    """x_sbe: (S, B, E) float32; encoder_padding_mask: (B, S) {0,1} (1 = pad);
    attn_mask: (S, S) {0,1} or None; packed: output of pack_params().
    Returns (S, B, E) in compute_dtype."""
    S, B, E = x_sbe.shape
    H = num_heads
    assert E % H == 0
    f32 = jnp.float32
    cdt = compute_dtype

    tq = q_block if q_block is not None else min(S, 128)
    assert S % tq == 0, "S must be a multiple of q_block  # TODO(synk): ragged tail"
    assert tq == S or tq % 8 == 0, "q_block should be a multiple of 8"
    n_q = S // tq

    # layout glue: (S,B,E) -> (B,S,E) so (S,E) is the resident VMEM tile.
    # TODO(synk): squeezed-batch BlockSpec on (S,B,E) to drop both transposes.
    x_bse = jnp.transpose(x_sbe, (1, 0, 2)).astype(cdt)

    # small additive masks (no (B,S,S) tensor is ever materialized):
    #   attn mask  (S,S)  : -1e8 where excluded   (resident, constant over batch)
    #   pad row    (B,1,S): -1e9 where padded     (finite -> no NaN on full-pad rows)
    if attn_mask is None:
        amask = jnp.zeros((S, S), f32)
    else:
        amask = jnp.where(attn_mask.astype(bool), f32(-1e8), f32(0.0))
    pad_add = jnp.where(encoder_padding_mask.astype(bool),
                        f32(-1e9), f32(0.0)).reshape(B, 1, S)

    wq, bq = packed["wq"], packed["bq"]
    wkv, bkv = packed["wkv"], packed["bkv"]
    wo, bo = packed["wo"], packed["bo"]
    w1, b1, w2, b2 = packed["w1"], packed["b1"], packed["w2"], packed["b2"]
    ln1w, ln1b = packed["ln1w"], packed["ln1b"]
    ln2w, ln2b = packed["ln2w"], packed["ln2b"]
    weights = (wq, bq, wkv, bkv, wo, bo, ln1w, ln1b, w1, b1, w2, b2, ln2w, ln2b)
    F = w1.shape[1]

    def wspec(arr):                      # resident weights: constant block index
        nd = arr.ndim
        return pl.BlockSpec(arr.shape, lambda b, q, _nd=nd: (0,) * _nd)

    vmem_limit = _derive_vmem_limit(weights, S, E, F, H, tq, cdt)

    out_bse = pl.pallas_call(
        functools.partial(_encoder_layer_kernel, H, tq),
        out_shape=jax.ShapeDtypeStruct((B, S, E), cdt),
        grid=(B, n_q),
        in_specs=[
            pl.BlockSpec((tq, S), lambda b, q: (q, 0)),        # additive attn-mask tile
            pl.BlockSpec((1, 1, S), lambda b, q: (b, 0, 0)),   # additive pad row
            pl.BlockSpec((1, S, E), lambda b, q: (b, 0, 0)),   # x (resident per batch)
            wspec(wq), wspec(bq), wspec(wkv), wspec(bkv), wspec(wo), wspec(bo),
            wspec(ln1w), wspec(ln1b),
            wspec(w1), wspec(b1), wspec(w2), wspec(b2),
            wspec(ln2w), wspec(ln2b),
        ],
        out_specs=pl.BlockSpec((1, tq, E), lambda b, q: (b, q, 0)),
        scratch_shapes=[
            pltpu.VMEM((H, S, E // H), cdt),   # K heads (persist across q tiles)
            pltpu.VMEM((H, S, E // H), cdt),   # V heads
        ],
        compiler_params=pltpu.CompilerParams(
            dimension_semantics=("parallel", "arbitrary"),
            vmem_limit_bytes=vmem_limit),
    )(amask, pad_add, x_bse, wq, bq, wkv, bkv, wo, bo,
      ln1w, ln1b, w1, b1, w2, b2, ln2w, ln2b)

    return jnp.transpose(out_bse, (1, 0, 2))


def reference_layer(x_sbe, encoder_padding_mask, attn_mask, params, num_heads,
                    compute_dtype=jnp.bfloat16):
    """Pure-JAX reference of the same forward pass with matching mixed precision
    (bf16 matmul operands, f32 accumulation / softmax / LayerNorm)."""
    S, B, E = x_sbe.shape
    H = num_heads
    Dh = E // H
    f32 = jnp.float32
    cdt = compute_dtype
    x32 = jnp.transpose(x_sbe, (1, 0, 2)).astype(cdt).astype(f32)   # mirror input rounding

    def ln(v, w, b):
        m = v.mean(-1, keepdims=True)
        var = ((v - m) ** 2).mean(-1, keepdims=True)
        return (v - m) * jax.lax.rsqrt(var + LN_EPS) * w + b

    def lin(v32, w, b):
        return jnp.einsum('bse,oe->bso', v32.astype(cdt),
                          jnp.asarray(w, f32).astype(cdt),
                          preferred_element_type=f32) + jnp.asarray(b, f32)

    q = lin(x32, params["q_weight"], params["q_bias"])
    k = lin(x32, params["k_weight"], params["k_bias"])
    v = lin(x32, params["v_weight"], params["v_bias"])
    qh = q.reshape(B, S, H, Dh).astype(cdt)
    kh = k.reshape(B, S, H, Dh).astype(cdt)
    vh = v.reshape(B, S, H, Dh).astype(cdt)
    s = jnp.einsum('bqhd,bkhd->bhqk', qh, kh, preferred_element_type=f32)
    s = s * (Dh ** -0.5)
    if attn_mask is not None:
        s = s + jnp.where(attn_mask.astype(bool), f32(-1e8), 0.0)[None, None]
    s = s + jnp.where(encoder_padding_mask.astype(bool),
                      f32(-1e9), 0.0)[:, None, None, :]
    p = jax.nn.softmax(s, axis=-1)
    ctx = jnp.einsum('bhqk,bkhd->bqhd', p.astype(cdt), vh,
                     preferred_element_type=f32).reshape(B, S, E)
    o = lin(ctx, params["out_weight"], params["out_bias"])
    y1 = ln(x32 + o, params["ln1_weight"], params["ln1_bias"])
    h = jax.nn.relu(lin(y1, params["fc1_weight"], params["fc1_bias"]))
    f = lin(h, params["fc2_weight"], params["fc2_bias"])
    y2 = ln(y1 + f, params["ln2_weight"], params["ln2_bias"])
    return jnp.transpose(y2, (1, 0, 2))


def init_params(key, embed_dim, ffn_dim):
    ks = jax.random.split(key, 8)
    sc = 0.1
    return {
        "q_weight": sc * jax.random.normal(ks[0], (embed_dim, embed_dim), jnp.float32),
        "q_bias": sc * jax.random.normal(ks[1], (embed_dim,), jnp.float32),
        "k_weight": sc * jax.random.normal(ks[2], (embed_dim, embed_dim), jnp.float32),
        "k_bias": jnp.zeros((embed_dim,), jnp.float32),
        "v_weight": sc * jax.random.normal(ks[3], (embed_dim, embed_dim), jnp.float32),
        "v_bias": jnp.zeros((embed_dim,), jnp.float32),
        "out_weight": sc * jax.random.normal(ks[4], (embed_dim, embed_dim), jnp.float32),
        "out_bias": jnp.zeros((embed_dim,), jnp.float32),
        "fc1_weight": sc * jax.random.normal(ks[5], (ffn_dim, embed_dim), jnp.float32),
        "fc1_bias": sc * jax.random.normal(ks[6], (ffn_dim,), jnp.float32),
        "fc2_weight": sc * jax.random.normal(ks[7], (embed_dim, ffn_dim), jnp.float32),
        "fc2_bias": jnp.zeros((embed_dim,), jnp.float32),
        "ln1_weight": jnp.ones((embed_dim,), jnp.float32),
        "ln1_bias": jnp.zeros((embed_dim,), jnp.float32),
        "ln2_weight": jnp.ones((embed_dim,), jnp.float32),
        "ln2_bias": jnp.zeros((embed_dim,), jnp.float32),
    }


if __name__ == "__main__":
    SEQ, BATCH, EMBED, HEADS, FFN = 16, 2, 32, 4, 64
    Q_BLOCK = 8   # exercises both grid axes: grid = (B=2, S//tQ=2)

    key = jax.random.PRNGKey(0)
    kx, kp = jax.random.split(key)
    params = init_params(kp, EMBED, FFN)
    packed = pack_params(params, HEADS)            # one-time weight packing

    x = jax.random.normal(kx, (SEQ, BATCH, EMBED), jnp.float32)   # (S, B, E)

    # encoder_padding_mask: (B, S), 1 = padding. Batch 1 has last 2 tokens padded.
    encoder_padding_mask = jnp.zeros((BATCH, SEQ), jnp.int32)
    encoder_padding_mask = encoder_padding_mask.at[1, SEQ - 2:].set(1)

    # attn_mask: (S, S), 1 = exclude src_j when computing tgt_i
    ii = jnp.arange(SEQ)[:, None]
    jj = jnp.arange(SEQ)[None, :]
    attn_mask = (jj > ii + 5).astype(jnp.int32)

    out = context_encoder_layer(x, encoder_padding_mask, attn_mask, packed,
                                HEADS, q_block=Q_BLOCK)
    out = jax.block_until_ready(out)

    ref = jax.block_until_ready(
        reference_layer(x, encoder_padding_mask, attn_mask, params, HEADS))

    assert out.shape == (SEQ, BATCH, EMBED), out.shape
    outf = out.astype(jnp.float32)
    reff = ref.astype(jnp.float32)
    assert bool(jnp.all(jnp.isfinite(outf)))
    max_err = float(jnp.max(jnp.abs(outf - reff)))
    assert jnp.allclose(outf, reff, atol=2e-2, rtol=2e-2), max_err

    print("KERNEL_OK")
</pallas_src>

<mosaic_0001>
module attributes {stable_mosaic.version = 11 : i64} {
  func.func @_encoder_layer_kernel(%arg0: i32, %arg1: i32, %arg2: memref<8x16xf32, #tpu.memory_space<vmem>>, %arg3: memref<1x1x16xf32, #tpu.memory_space<vmem>>, %arg4: memref<1x16x32xbf16, #tpu.memory_space<vmem>>, %arg5: memref<32x32xbf16, #tpu.memory_space<vmem>>, %arg6: memref<1x32xf32, #tpu.memory_space<vmem>>, %arg7: memref<32x64xbf16, #tpu.memory_space<vmem>>, %arg8: memref<1x64xf32, #tpu.memory_space<vmem>>, %arg9: memref<4x8x32xbf16, #tpu.memory_space<vmem>>, %arg10: memref<1x32xf32, #tpu.memory_space<vmem>>, %arg11: memref<1x32xf32, #tpu.memory_space<vmem>>, %arg12: memref<1x32xf32, #tpu.memory_space<vmem>>, %arg13: memref<32x64xbf16, #tpu.memory_space<vmem>>, %arg14: memref<1x64xf32, #tpu.memory_space<vmem>>, %arg15: memref<64x32xbf16, #tpu.memory_space<vmem>>, %arg16: memref<1x32xf32, #tpu.memory_space<vmem>>, %arg17: memref<1x32xf32, #tpu.memory_space<vmem>>, %arg18: memref<1x32xf32, #tpu.memory_space<vmem>>, %arg19: memref<1x8x32xbf16, #tpu.memory_space<vmem>>, %arg20: memref<4x16x8xbf16, #tpu.memory_space<vmem>>, %arg21: memref<4x16x8xbf16, #tpu.memory_space<vmem>>) attributes {dimension_semantics = [#tpu.dimension_semantics<parallel>, #tpu.dimension_semantics<arbitrary>], iteration_bounds = array<i64: 2, 2>, scalar_prefetch = 0 : i64, scratch_operands = 2 : i64, tpu.core_type = #tpu.core_type<tc>, window_params = [{transform_indices = @transform_0, window_bounds = array<i64: 8, 16>}, {transform_indices = @transform_1, window_bounds = array<i64: 1, 1, 16>}, {transform_indices = @transform_2, window_bounds = array<i64: 1, 16, 32>}, {pipeline_mode = #tpu.pipeline_mode<synchronous>, transform_indices = @transform_3, window_bounds = array<i64: 32, 32>}, {pipeline_mode = #tpu.pipeline_mode<synchronous>, transform_indices = @transform_4, window_bounds = array<i64: 1, 32>}, {pipeline_mode = #tpu.pipeline_mode<synchronous>, transform_indices = @transform_5, window_bounds = array<i64: 32, 64>}, {pipeline_mode = #tpu.pipeline_mode<synchronous>, transform_indices = @transform_6, window_bounds = array<i64: 1, 64>}, {pipeline_mode = #tpu.pipeline_mode<synchronous>, transform_indices = @transform_7, window_bounds = array<i64: 4, 8, 32>}, {pipeline_mode = #tpu.pipeline_mode<synchronous>, transform_indices = @transform_8, window_bounds = array<i64: 1, 32>}, {pipeline_mode = #tpu.pipeline_mode<synchronous>, transform_indices = @transform_9, window_bounds = array<i64: 1, 32>}, {pipeline_mode = #tpu.pipeline_mode<synchronous>, transform_indices = @transform_10, window_bounds = array<i64: 1, 32>}, {pipeline_mode = #tpu.pipeline_mode<synchronous>, transform_indices = @transform_11, window_bounds = array<i64: 32, 64>}, {pipeline_mode = #tpu.pipeline_mode<synchronous>, transform_indices = @transform_12, window_bounds = array<i64: 1, 64>}, {pipeline_mode = #tpu.pipeline_mode<synchronous>, transform_indices = @transform_13, window_bounds = array<i64: 64, 32>}, {pipeline_mode = #tpu.pipeline_mode<synchronous>, transform_indices = @transform_14, window_bounds = array<i64: 1, 32>}, {pipeline_mode = #tpu.pipeline_mode<synchronous>, transform_indices = @transform_15, window_bounds = array<i64: 1, 32>}, {pipeline_mode = #tpu.pipeline_mode<synchronous>, transform_indices = @transform_16, window_bounds = array<i64: 1, 32>}, {transform_indices = @transform_17, window_bounds = array<i64: 1, 8, 32>}]} {
    %c0_i32 = arith.constant 0 : i32
    %0 = arith.cmpi eq, %arg1, %c0_i32 : i32
    %1 = arith.extui %0 : i1 to i32
    %c0_i32_0 = arith.constant 0 : i32
    %2 = arith.cmpi ne, %1, %c0_i32_0 : i32
    scf.if %2 {
      %c0_68 = arith.constant 0 : index
      %c0_69 = arith.constant 0 : index
      %c0_70 = arith.constant 0 : index
      %136 = vector.load %arg4[%c0_68, %c0_69, %c0_70] : memref<1x16x32xbf16, #tpu.memory_space<vmem>>, vector<1x16x32xbf16>
      %137 = vector.shape_cast %136 : vector<1x16x32xbf16> to vector<16x32xbf16>
      %c0_71 = arith.constant 0 : index
      %c0_72 = arith.constant 0 : index
      %138 = vector.load %arg7[%c0_71, %c0_72] : memref<32x64xbf16, #tpu.memory_space<vmem>>, vector<32x64xbf16>
      %cst_73 = arith.constant dense<0.000000e+00> : vector<16x64xf32>
      %139 = tpu.matmul %137, %138, %cst_73 {dimension_numbers = #tpu.dot_dimension_numbers<[1], [0], [0], [1], [0, 0, 1, 1], [], []>} : vector<16x32xbf16>, vector<32x64xbf16>, vector<16x64xf32> -> vector<16x64xf32>
      %c0_74 = arith.constant 0 : index
      %c0_75 = arith.constant 0 : index
      %140 = vector.load %arg8[%c0_74, %c0_75] : memref<1x64xf32, #tpu.memory_space<vmem>>, vector<1x64xf32>
      %141 = vector.broadcast %140 : vector<1x64xf32> to vector<16x64xf32>
      %142 = arith.addf %139, %141 : vector<16x64xf32>
      %143 = vector.shape_cast %142 : vector<16x64xf32> to vector<16x8x8xf32>
      %144 = tpu.transpose %143, [1, 0, 2] : vector<16x8x8xf32> -> vector<8x16x8xf32>
      %145 = arith.truncf %144 : vector<8x16x8xf32> to vector<8x16x8xbf16>
      %146 = vector.extract_strided_slice %145 {offsets = [0, 0, 0], sizes = [4, 16, 8], strides = [1, 1, 1]} : vector<8x16x8xbf16> to vector<4x16x8xbf16>
      %c0_76 = arith.constant 0 : index
      %c0_77 = arith.constant 0 : index
      %c0_78 = arith.constant 0 : index
      %147 = vector.load %arg20[%c0_76, %c0_77, %c0_78] : memref<4x16x8xbf16, #tpu.memory_space<vmem>>, vector<4x16x8xbf16>
      tpu.vector_store %arg20[%c0_76, %c0_77, %c0_78], %146 {strides = array<i32>} : memref<4x16x8xbf16, #tpu.memory_space<vmem>>, vector<4x16x8xbf16>,
      %148 = vector.extract_strided_slice %145 {offsets = [4, 0, 0], sizes = [4, 16, 8], strides = [1, 1, 1]} : vector<8x16x8xbf16> to vector<4x16x8xbf16>
      %c0_79 = arith.constant 0 : index
      %c0_80 = arith.constant 0 : index
      %c0_81 = arith.constant 0 : index
      %149 = vector.load %arg21[%c0_79, %c0_80, %c0_81] : memref<4x16x8xbf16, #tpu.memory_space<vmem>>, vector<4x16x8xbf16>
      tpu.vector_store %arg21[%c0_79, %c0_80, %c0_81], %148 {strides = array<i32>} : memref<4x16x8xbf16, #tpu.memory_space<vmem>>, vector<4x16x8xbf16>,
    } else {
    }
    %c8_i32 = arith.constant 8 : i32
    %3 = arith.muli %arg1, %c8_i32 : i32
    %4 = tpu.assume_multiple %3, 8 : i32
    %c0 = arith.constant 0 : index
    %5 = arith.index_cast %4 : i32 to index
    %c0_1 = arith.constant 0 : index
    %6 = vector.load %arg4[%c0, %5, %c0_1] : memref<1x16x32xbf16, #tpu.memory_space<vmem>>, vector<1x8x32xbf16>
    %7 = vector.shape_cast %6 : vector<1x8x32xbf16> to vector<8x32xbf16>
    %c0_2 = arith.constant 0 : index
    %c0_3 = arith.constant 0 : index
    %8 = vector.load %arg5[%c0_2, %c0_3] : memref<32x32xbf16, #tpu.memory_space<vmem>>, vector<32x32xbf16>
    %cst = arith.constant dense<0.000000e+00> : vector<8x32xf32>
    %9 = tpu.matmul %7, %8, %cst {dimension_numbers = #tpu.dot_dimension_numbers<[1], [0], [0], [1], [0, 0, 1, 1], [], []>} : vector<8x32xbf16>, vector<32x32xbf16>, vector<8x32xf32> -> vector<8x32xf32>
    %c0_4 = arith.constant 0 : index
    %c0_5 = arith.constant 0 : index
    %10 = vector.load %arg6[%c0_4, %c0_5] : memref<1x32xf32, #tpu.memory_space<vmem>>, vector<1x32xf32>
    %11 = vector.broadcast %10 : vector<1x32xf32> to vector<8x32xf32>
    %12 = arith.addf %9, %11 : vector<8x32xf32>
    %13 = vector.shape_cast %12 : vector<8x32xf32> to vector<8x4x8xf32>
    %14 = tpu.transpose %13, [1, 0, 2] : vector<8x4x8xf32> -> vector<4x8x8xf32>
    %15 = arith.truncf %14 : vector<4x8x8xf32> to vector<4x8x8xbf16>
    %c0_6 = arith.constant 0 : index
    %c0_7 = arith.constant 0 : index
    %c0_8 = arith.constant 0 : index
    %16 = vector.load %arg20[%c0_6, %c0_7, %c0_8] : memref<4x16x8xbf16, #tpu.memory_space<vmem>>, vector<4x16x8xbf16>
    "tpu.trace_start"() <{level = 10 : i32, message = "hqd,hkd->hqk"}> : () -> ()
    %cst_9 = arith.constant dense<0.000000e+00> : vector<4x8x16xf32>
    %17 = tpu.matmul %15, %16, %cst_9 {dimension_numbers = #tpu.dot_dimension_numbers<[2], [2], [1], [1], [0, 0, 0, 1, 1, 1], [0], [0]>} : vector<4x8x8xbf16>, vector<4x16x8xbf16>, vector<4x8x16xf32> -> vector<4x8x16xf32>
    "tpu.trace_stop"() : () -> ()
    %c0_10 = arith.constant 0 : index
    %c0_11 = arith.constant 0 : index
    %18 = vector.load %arg2[%c0_10, %c0_11] : memref<8x16xf32, #tpu.memory_space<vmem>>, vector<8x16xf32>
    %19 = vector.shape_cast %18 : vector<8x16xf32> to vector<1x8x16xf32>
    %20 = vector.broadcast %19 : vector<1x8x16xf32> to vector<4x8x16xf32>
    %21 = arith.addf %17, %20 : vector<4x8x16xf32>
    %c0_12 = arith.constant 0 : index
    %c0_13 = arith.constant 0 : index
    %c0_14 = arith.constant 0 : index
    %22 = vector.load %arg3[%c0_12, %c0_13, %c0_14] : memref<1x1x16xf32, #tpu.memory_space<vmem>>, vector<1x1x16xf32>
    %23 = vector.shape_cast %22 : vector<1x1x16xf32> to vector<1x16xf32>
    %24 = vector.shape_cast %23 : vector<1x16xf32> to vector<1x1x16xf32>
    %25 = vector.broadcast %24 : vector<1x1x16xf32> to vector<4x8x16xf32>
    %26 = arith.addf %21, %25 : vector<4x8x16xf32>
    %cst_15 = arith.constant dense<0xFF800000> : vector<4x8xf32>
    %27 = vector.multi_reduction <maximumf>, %26, %cst_15 [2] : vector<4x8x16xf32> to vector<4x8xf32>
    %28 = vector.shape_cast %27 : vector<4x8xf32> to vector<4x8x1xf32>
    %29 = vector.broadcast %28 : vector<4x8x1xf32> to vector<4x8x16xf32>
    %30 = arith.subf %26, %29 : vector<4x8x16xf32>
    %31 = math.exp %30 : vector<4x8x16xf32>
    %cst_16 = arith.constant dense<0.000000e+00> : vector<4x8xf32>
    %32 = vector.multi_reduction <add>, %31, %cst_16 [2] : vector<4x8x16xf32> to vector<4x8xf32>
    %33 = vector.shape_cast %32 : vector<4x8xf32> to vector<4x8x1xf32>
    %34 = tpu.reciprocal %33 {approx = true} : vector<4x8x1xf32> -> vector<4x8x1xf32>
    %35 = vector.broadcast %34 : vector<4x8x1xf32> to vector<4x8x16xf32>
    %36 = arith.mulf %31, %35 : vector<4x8x16xf32>
    %37 = arith.truncf %36 : vector<4x8x16xf32> to vector<4x8x16xbf16>
    %c0_17 = arith.constant 0 : index
    %c0_18 = arith.constant 0 : index
    %c0_19 = arith.constant 0 : index
    %38 = vector.load %arg21[%c0_17, %c0_18, %c0_19] : memref<4x16x8xbf16, #tpu.memory_space<vmem>>, vector<4x16x8xbf16>
    "tpu.trace_start"() <{level = 10 : i32, message = "hqk,hkd->hqd"}> : () -> ()
    %cst_20 = arith.constant dense<0.000000e+00> : vector<4x8x8xf32>
    %39 = tpu.matmul %37, %38, %cst_20 {dimension_numbers = #tpu.dot_dimension_numbers<[2], [1], [1], [2], [0, 0, 0, 1, 1, 2], [0], [0]>} : vector<4x8x16xbf16>, vector<4x16x8xbf16>, vector<4x8x8xf32> -> vector<4x8x8xf32>
    "tpu.trace_stop"() : () -> ()
    %40 = arith.truncf %39 : vector<4x8x8xf32> to vector<4x8x8xbf16>
    %41 = vector.extract_strided_slice %40 {offsets = [0, 0, 0], sizes = [1, 8, 8], strides = [1, 1, 1]} : vector<4x8x8xbf16> to vector<1x8x8xbf16>
    %42 = vector.shape_cast %41 : vector<1x8x8xbf16> to vector<8x8xbf16>
    %c0_21 = arith.constant 0 : index
    %c0_22 = arith.constant 0 : index
    %c0_23 = arith.constant 0 : index
    %43 = vector.load %arg9[%c0_21, %c0_22, %c0_23] : memref<4x8x32xbf16, #tpu.memory_space<vmem>>, vector<1x8x32xbf16>
    %44 = vector.shape_cast %43 : vector<1x8x32xbf16> to vector<8x32xbf16>
    %cst_24 = arith.constant dense<0.000000e+00> : vector<8x32xf32>
    %45 = tpu.matmul %42, %44, %cst_24 {dimension_numbers = #tpu.dot_dimension_numbers<[1], [0], [0], [1], [0, 0, 1, 1], [], []>} : vector<8x8xbf16>, vector<8x32xbf16>, vector<8x32xf32> -> vector<8x32xf32>
    %46 = vector.extract_strided_slice %40 {offsets = [1, 0, 0], sizes = [1, 8, 8], strides = [1, 1, 1]} : vector<4x8x8xbf16> to vector<1x8x8xbf16>
    %47 = vector.shape_cast %46 : vector<1x8x8xbf16> to vector<8x8xbf16>
    %c1 = arith.constant 1 : index
    %c0_25 = arith.constant 0 : index
    %c0_26 = arith.constant 0 : index
    %48 = vector.load %arg9[%c1, %c0_25, %c0_26] : memref<4x8x32xbf16, #tpu.memory_space<vmem>>, vector<1x8x32xbf16>
    %49 = vector.shape_cast %48 : vector<1x8x32xbf16> to vector<8x32xbf16>
    %cst_27 = arith.constant dense<0.000000e+00> : vector<8x32xf32>
    %50 = tpu.matmul %47, %49, %cst_27 {dimension_numbers = #tpu.dot_dimension_numbers<[1], [0], [0], [1], [0, 0, 1, 1], [], []>} : vector<8x8xbf16>, vector<8x32xbf16>, vector<8x32xf32> -> vector<8x32xf32>
    %51 = arith.addf %45, %50 : vector<8x32xf32>
    %52 = vector.extract_strided_slice %40 {offsets = [2, 0, 0], sizes = [1, 8, 8], strides = [1, 1, 1]} : vector<4x8x8xbf16> to vector<1x8x8xbf16>
    %53 = vector.shape_cast %52 : vector<1x8x8xbf16> to vector<8x8xbf16>
    %c2 = arith.constant 2 : index
    %c0_28 = arith.constant 0 : index
    %c0_29 = arith.constant 0 : index
    %54 = vector.load %arg9[%c2, %c0_28, %c0_29] : memref<4x8x32xbf16, #tpu.memory_space<vmem>>, vector<1x8x32xbf16>
    %55 = vector.shape_cast %54 : vector<1x8x32xbf16> to vector<8x32xbf16>
    %cst_30 = arith.constant dense<0.000000e+00> : vector<8x32xf32>
    %56 = tpu.matmul %53, %55, %cst_30 {dimension_numbers = #tpu.dot_dimension_numbers<[1], [0], [0], [1], [0, 0, 1, 1], [], []>} : vector<8x8xbf16>, vector<8x32xbf16>, vector<8x32xf32> -> vector<8x32xf32>
    %57 = arith.addf %51, %56 : vector<8x32xf32>
    %58 = vector.extract_strided_slice %40 {offsets = [3, 0, 0], sizes = [1, 8, 8], strides = [1, 1, 1]} : vector<4x8x8xbf16> to vector<1x8x8xbf16>
    %59 = vector.shape_cast %58 : vector<1x8x8xbf16> to vector<8x8xbf16>
    %c3 = arith.constant 3 : index
    %c0_31 = arith.constant 0 : index
    %c0_32 = arith.constant 0 : index
    %60 = vector.load %arg9[%c3, %c0_31, %c0_32] : memref<4x8x32xbf16, #tpu.memory_space<vmem>>, vector<1x8x32xbf16>
    %61 = vector.shape_cast %60 : vector<1x8x32xbf16> to vector<8x32xbf16>
    %cst_33 = arith.constant dense<0.000000e+00> : vector<8x32xf32>
    %62 = tpu.matmul %59, %61, %cst_33 {dimension_numbers = #tpu.dot_dimension_numbers<[1], [0], [0], [1], [0, 0, 1, 1], [], []>} : vector<8x8xbf16>, vector<8x32xbf16>, vector<8x32xf32> -> vector<8x32xf32>
    %63 = arith.addf %57, %62 : vector<8x32xf32>
    %c0_34 = arith.constant 0 : index
    %c0_35 = arith.constant 0 : index
    %64 = vector.load %arg10[%c0_34, %c0_35] : memref<1x32xf32, #tpu.memory_space<vmem>>, vector<1x32xf32>
    %65 = vector.broadcast %64 : vector<1x32xf32> to vector<8x32xf32>
    %66 = arith.addf %63, %65 : vector<8x32xf32>
    %67 = arith.extf %7 : vector<8x32xbf16> to vector<8x32xf32>
    %68 = arith.addf %67, %66 : vector<8x32xf32>
    %c0_36 = arith.constant 0 : index
    %c0_37 = arith.constant 0 : index
    %69 = vector.load %arg11[%c0_36, %c0_37] : memref<1x32xf32, #tpu.memory_space<vmem>>, vector<1x32xf32>
    %c0_38 = arith.constant 0 : index
    %c0_39 = arith.constant 0 : index
    %70 = vector.load %arg12[%c0_38, %c0_39] : memref<1x32xf32, #tpu.memory_space<vmem>>, vector<1x32xf32>
    %cst_40 = arith.constant dense<0.000000e+00> : vector<8xf32>
    %71 = vector.multi_reduction <add>, %68, %cst_40 [1] : vector<8x32xf32> to vector<8xf32>
    %72 = vector.shape_cast %71 : vector<8xf32> to vector<8x1xf32>
    %cst_41 = arith.constant 3.200000e+01 : f32
    %73 = vector.broadcast %cst_41 : f32 to vector<8x1xf32>
    %74 = arith.divf %72, %73 : vector<8x1xf32>
    %75 = vector.broadcast %74 : vector<8x1xf32> to vector<8x32xf32>
    %76 = arith.subf %68, %75 : vector<8x32xf32>
    %77 = arith.mulf %76, %76 : vector<8x32xf32>
    %cst_42 = arith.constant dense<0.000000e+00> : vector<8xf32>
    %78 = vector.multi_reduction <add>, %77, %cst_42 [1] : vector<8x32xf32> to vector<8xf32>
    %79 = vector.shape_cast %78 : vector<8xf32> to vector<8x1xf32>
    %cst_43 = arith.constant 3.200000e+01 : f32
    %80 = vector.broadcast %cst_43 : f32 to vector<8x1xf32>
    %81 = arith.divf %79, %80 : vector<8x1xf32>
    %82 = vector.broadcast %74 : vector<8x1xf32> to vector<8x32xf32>
    %83 = arith.subf %68, %82 : vector<8x32xf32>
    %cst_44 = arith.constant 9.99999974E-6 : f32
    %84 = vector.broadcast %cst_44 : f32 to vector<8x1xf32>
    %85 = arith.addf %81, %84 : vector<8x1xf32>
    %86 = math.rsqrt %85 : vector<8x1xf32>
    %87 = vector.broadcast %86 : vector<8x1xf32> to vector<8x32xf32>
    %88 = arith.mulf %83, %87 : vector<8x32xf32>
    %89 = vector.broadcast %69 : vector<1x32xf32> to vector<8x32xf32>
    %90 = arith.mulf %88, %89 : vector<8x32xf32>
    %91 = vector.broadcast %70 : vector<1x32xf32> to vector<8x32xf32>
    %92 = arith.addf %90, %91 : vector<8x32xf32>
    %93 = arith.truncf %92 : vector<8x32xf32> to vector<8x32xbf16>
    %c0_45 = arith.constant 0 : index
    %c0_46 = arith.constant 0 : index
    %94 = vector.load %arg13[%c0_45, %c0_46] : memref<32x64xbf16, #tpu.memory_space<vmem>>, vector<32x64xbf16>
    %cst_47 = arith.constant dense<0.000000e+00> : vector<8x64xf32>
    %95 = tpu.matmul %93, %94, %cst_47 {dimension_numbers = #tpu.dot_dimension_numbers<[1], [0], [0], [1], [0, 0, 1, 1], [], []>} : vector<8x32xbf16>, vector<32x64xbf16>, vector<8x64xf32> -> vector<8x64xf32>
    %c0_48 = arith.constant 0 : index
    %c0_49 = arith.constant 0 : index
    %96 = vector.load %arg14[%c0_48, %c0_49] : memref<1x64xf32, #tpu.memory_space<vmem>>, vector<1x64xf32>
    %97 = vector.broadcast %96 : vector<1x64xf32> to vector<8x64xf32>
    %98 = arith.addf %95, %97 : vector<8x64xf32>
    %cst_50 = arith.constant 0.000000e+00 : f32
    %99 = vector.broadcast %cst_50 : f32 to vector<8x64xf32>
    %100 = arith.maximumf %98, %99 : vector<8x64xf32>
    %101 = arith.truncf %100 : vector<8x64xf32> to vector<8x64xbf16>
    %c0_51 = arith.constant 0 : index
    %c0_52 = arith.constant 0 : index
    %102 = vector.load %arg15[%c0_51, %c0_52] : memref<64x32xbf16, #tpu.memory_space<vmem>>, vector<64x32xbf16>
    %cst_53 = arith.constant dense<0.000000e+00> : vector<8x32xf32>
    %103 = tpu.matmul %101, %102, %cst_53 {dimension_numbers = #tpu.dot_dimension_numbers<[1], [0], [0], [1], [0, 0, 1, 1], [], []>} : vector<8x64xbf16>, vector<64x32xbf16>, vector<8x32xf32> -> vector<8x32xf32>
    %c0_54 = arith.constant 0 : index
    %c0_55 = arith.constant 0 : index
    %104 = vector.load %arg16[%c0_54, %c0_55] : memref<1x32xf32, #tpu.memory_space<vmem>>, vector<1x32xf32>
    %105 = vector.broadcast %104 : vector<1x32xf32> to vector<8x32xf32>
    %106 = arith.addf %103, %105 : vector<8x32xf32>
    %107 = arith.addf %92, %106 : vector<8x32xf32>
    %c0_56 = arith.constant 0 : index
    %c0_57 = arith.constant 0 : index
    %108 = vector.load %arg17[%c0_56, %c0_57] : memref<1x32xf32, #tpu.memory_space<vmem>>, vector<1x32xf32>
    %c0_58 = arith.constant 0 : index
    %c0_59 = arith.constant 0 : index
    %109 = vector.load %arg18[%c0_58, %c0_59] : memref<1x32xf32, #tpu.memory_space<vmem>>, vector<1x32xf32>
    %cst_60 = arith.constant dense<0.000000e+00> : vector<8xf32>
    %110 = vector.multi_reduction <add>, %107, %cst_60 [1] : vector<8x32xf32> to vector<8xf32>
    %111 = vector.shape_cast %110 : vector<8xf32> to vector<8x1xf32>
    %cst_61 = arith.constant 3.200000e+01 : f32
    %112 = vector.broadcast %cst_61 : f32 to vector<8x1xf32>
    %113 = arith.divf %111, %112 : vector<8x1xf32>
    %114 = vector.broadcast %113 : vector<8x1xf32> to vector<8x32xf32>
    %115 = arith.subf %107, %114 : vector<8x32xf32>
    %116 = arith.mulf %115, %115 : vector<8x32xf32>
    %cst_62 = arith.constant dense<0.000000e+00> : vector<8xf32>
    %117 = vector.multi_reduction <add>, %116, %cst_62 [1] : vector<8x32xf32> to vector<8xf32>
    %118 = vector.shape_cast %117 : vector<8xf32> to vector<8x1xf32>
    %cst_63 = arith.constant 3.200000e+01 : f32
    %119 = vector.broadcast %cst_63 : f32 to vector<8x1xf32>
    %120 = arith.divf %118, %119 : vector<8x1xf32>
    %121 = vector.broadcast %113 : vector<8x1xf32> to vector<8x32xf32>
    %122 = arith.subf %107, %121 : vector<8x32xf32>
    %cst_64 = arith.constant 9.99999974E-6 : f32
    %123 = vector.broadcast %cst_64 : f32 to vector<8x1xf32>
    %124 = arith.addf %120, %123 : vector<8x1xf32>
    %125 = math.rsqrt %124 : vector<8x1xf32>
    %126 = vector.broadcast %125 : vector<8x1xf32> to vector<8x32xf32>
    %127 = arith.mulf %122, %126 : vector<8x32xf32>
    %128 = vector.broadcast %108 : vector<1x32xf32> to vector<8x32xf32>
    %129 = arith.mulf %127, %128 : vector<8x32xf32>
    %130 = vector.broadcast %109 : vector<1x32xf32> to vector<8x32xf32>
    %131 = arith.addf %129, %130 : vector<8x32xf32>
    %132 = arith.truncf %131 : vector<8x32xf32> to vector<8x32xbf16>
    %c0_65 = arith.constant 0 : index
    %c0_66 = arith.constant 0 : index
    %c0_67 = arith.constant 0 : index
    %133 = vector.load %arg19[%c0_65, %c0_66, %c0_67] : memref<1x8x32xbf16, #tpu.memory_space<vmem>>, vector<1x8x32xbf16>
    %134 = vector.shape_cast %133 : vector<1x8x32xbf16> to vector<8x32xbf16>
    %135 = vector.shape_cast %132 : vector<8x32xbf16> to vector<1x8x32xbf16>
    tpu.vector_store %arg19[%c0_65, %c0_66, %c0_67], %135 {strides = array<i32>} : memref<1x8x32xbf16, #tpu.memory_space<vmem>>, vector<1x8x32xbf16>,
    return
  }
  func.func @transform_0(%arg0: i32, %arg1: i32) -> (i32, i32) {
    %c0_i32 = arith.constant 0 : i32
    %c0_i32_0 = arith.constant 0 : i32
    return %arg1, %c0_i32 : i32, i32
  }
  func.func @transform_1(%arg0: i32, %arg1: i32) -> (i32, i32, i32) {
    %c0_i32 = arith.constant 0 : i32
    %c0_i32_0 = arith.constant 0 : i32
    %c0_i32_1 = arith.constant 0 : i32
    return %arg0, %c0_i32, %c0_i32_0 : i32, i32, i32
  }
  func.func @transform_2(%arg0: i32, %arg1: i32) -> (i32, i32, i32) {
    %c0_i32 = arith.constant 0 : i32
    %c0_i32_0 = arith.constant 0 : i32
    %c0_i32_1 = arith.constant 0 : i32
    return %arg0, %c0_i32, %c0_i32_0 : i32, i32, i32
  }
  func.func @transform_3(%arg0: i32, %arg1: i32) -> (i32, i32) {
    %c0_i32 = arith.constant 0 : i32
    %c0_i32_0 = arith.constant 0 : i32
    %c0_i32_1 = arith.constant 0 : i32
    return %c0_i32, %c0_i32_0 : i32, i32
  }
  func.func @transform_4(%arg0: i32, %arg1: i32) -> (i32, i32) {
    %c0_i32 = arith.constant 0 : i32
    %c0_i32_0 = arith.constant 0 : i32
    %c0_i32_1 = arith.constant 0 : i32
    return %c0_i32, %c0_i32_0 : i32, i32
  }
  func.func @transform_5(%arg0: i32, %arg1: i32) -> (i32, i32) {
    %c0_i32 = arith.constant 0 : i32
    %c0_i32_0 = arith.constant 0 : i32
    %c0_i32_1 = arith.constant 0 : i32
    return %c0_i32, %c0_i32_0 : i32, i32
  }
  func.func @transform_6(%arg0: i32, %arg1: i32) -> (i32, i32) {
    %c0_i32 = arith.constant 0 : i32
    %c0_i32_0 = arith.constant 0 : i32
    %c0_i32_1 = arith.constant 0 : i32
    return %c0_i32, %c0_i32_0 : i32, i32
  }
  func.func @transform_7(%arg0: i32, %arg1: i32) -> (i32, i32, i32) {
    %c0_i32 = arith.constant 0 : i32
    %c0_i32_0 = arith.constant 0 : i32
    %c0_i32_1 = arith.constant 0 : i32
    %c0_i32_2 = arith.constant 0 : i32
    return %c0_i32, %c0_i32_0, %c0_i32_1 : i32, i32, i32
  }
  func.func @transform_8(%arg0: i32, %arg1: i32) -> (i32, i32) {
    %c0_i32 = arith.constant 0 : i32
    %c0_i32_0 = arith.constant 0 : i32
    %c0_i32_1 = arith.constant 0 : i32
    return %c0_i32, %c0_i32_0 : i32, i32
  }
  func.func @transform_9(%arg0: i32, %arg1: i32) -> (i32, i32) {
    %c0_i32 = arith.constant 0 : i32
    %c0_i32_0 = arith.constant 0 : i32
    %c0_i32_1 = arith.constant 0 : i32
    return %c0_i32, %c0_i32_0 : i32, i32
  }
  func.func @transform_10(%arg0: i32, %arg1: i32) -> (i32, i32) {
    %c0_i32 = arith.constant 0 : i32
    %c0_i32_0 = arith.constant 0 : i32
    %c0_i32_1 = arith.constant 0 : i32
    return %c0_i32, %c0_i32_0 : i32, i32
  }
  func.func @transform_11(%arg0: i32, %arg1: i32) -> (i32, i32) {
    %c0_i32 = arith.constant 0 : i32
    %c0_i32_0 = arith.constant 0 : i32
    %c0_i32_1 = arith.constant 0 : i32
    return %c0_i32, %c0_i32_0 : i32, i32
  }
  func.func @transform_12(%arg0: i32, %arg1: i32) -> (i32, i32) {
    %c0_i32 = arith.constant 0 : i32
    %c0_i32_0 = arith.constant 0 : i32
    %c0_i32_1 = arith.constant 0 : i32
    return %c0_i32, %c0_i32_0 : i32, i32
  }
  func.func @transform_13(%arg0: i32, %arg1: i32) -> (i32, i32) {
    %c0_i32 = arith.constant 0 : i32
    %c0_i32_0 = arith.constant 0 : i32
    %c0_i32_1 = arith.constant 0 : i32
    return %c0_i32, %c0_i32_0 : i32, i32
  }
  func.func @transform_14(%arg0: i32, %arg1: i32) -> (i32, i32) {
    %c0_i32 = arith.constant 0 : i32
    %c0_i32_0 = arith.constant 0 : i32
    %c0_i32_1 = arith.constant 0 : i32
    return %c0_i32, %c0_i32_0 : i32, i32
  }
  func.func @transform_15(%arg0: i32, %arg1: i32) -> (i32, i32) {
    %c0_i32 = arith.constant 0 : i32
    %c0_i32_0 = arith.constant 0 : i32
    %c0_i32_1 = arith.constant 0 : i32
    return %c0_i32, %c0_i32_0 : i32, i32
  }
  func.func @transform_16(%arg0: i32, %arg1: i32) -> (i32, i32) {
    %c0_i32 = arith.constant 0 : i32
    %c0_i32_0 = arith.constant 0 : i32
    %c0_i32_1 = arith.constant 0 : i32
    return %c0_i32, %c0_i32_0 : i32, i32
  }
  func.func @transform_17(%arg0: i32, %arg1: i32) -> (i32, i32, i32) {
    %c0_i32 = arith.constant 0 : i32
    %c0_i32_0 = arith.constant 0 : i32
    return %arg0, %arg1, %c0_i32 : i32, i32, i32
  }
}

</mosaic_0001>

<bundles_post_ra>
// kernel: tpu_custom_call.1
= control target key start
LH: loop header
LB: loop body
LE: loop exit
PB: predicated region body
PF: predicated region fallthrough
CT: control target
= control target key end

     0   :  { %s4219_s0 = inlined_call_operand.vmem [shape: f32[16,16], index: 0, kind: input, shape index: {}]   ;;  %s4220_s1 = inlined_call_operand.hbm [shape: f32[2,1,16], index: 1, kind: input, shape index: {}]   ;;  %s4221_s2 = inlined_call_operand.vmem [shape: bf16[2,16,32], index: 2, kind: input, shape index: {}]   ;;  %s4222_s3 = inlined_call_operand.vmem [shape: bf16[32,32], index: 3, kind: input, shape index: {}]   ;;  %s4223_s4 = inlined_call_operand.hbm [shape: f32[1,32], index: 4, kind: input, shape index: {}]   ;;  %s4224_s5 = inlined_call_operand.hbm [shape: bf16[32,64], index: 5, kind: input, shape index: {}]   ;;  %s4225_s6 = inlined_call_operand.hbm [shape: f32[1,64], index: 6, kind: input, shape index: {}]   ;;  %s4226_s7 = inlined_call_operand.hbm [shape: bf16[4,8,32], index: 7, kind: input, shape index: {}]   ;;  %s4227_s8 = inlined_call_operand.hbm [shape: f32[1,32], index: 8, kind: input, shape index: {}]   ;;  %s4228_s9 = inlined_call_operand.hbm [shape: f32[1,32], index: 9, kind: input, shape index: {}]   ;;  %s4229_s10 = inlined_call_operand.vmem [shape: f32[1,32], index: 10, kind: input, shape index: {}]   ;;  %s4230_s11 = inlined_call_operand.vmem [shape: bf16[32,64], index: 11, kind: input, shape index: {}]   ;;  %s4231_s12 = inlined_call_operand.vmem [shape: f32[1,64], index: 12, kind: input, shape index: {}]   ;;  %s4232_s13 = inlined_call_operand.vmem [shape: bf16[64,32], index: 13, kind: input, shape index: {}]   ;;  %s4233_s14 = inlined_call_operand.vmem [shape: f32[1,32], index: 14, kind: input, shape index: {}]   ;;  %s4234_s15 = inlined_call_operand.vmem [shape: f32[1,32], index: 15, kind: input, shape index: {}]   ;;  %s4235_s16 = inlined_call_operand.vmem [shape: f32[1,32], index: 16, kind: input, shape index: {}]   ;;  %s4236_s17 = inlined_call_operand.hbm [shape: bf16[2,16,32], index: 17, kind: output, shape index: {}]  }
   0x1   :  { %4250 = sst [smem:[#allocation25_spill]] %s4219_s0 }
   0x2   :  { %4251 = sst [smem:[#allocation26_spill]] %s4220_s1 }
   0x3   :  { %4252 = sst [smem:[#allocation27_spill]] %s4221_s2 }
   0x4   :  { %4253 = sst [smem:[#allocation28_spill]] %s4222_s3 }
   0x5   :  { %4254 = sst [smem:[#allocation29_spill]] %s4223_s4 }
   0x6   :  { %4255 = sst [smem:[#allocation30_spill]] %s4224_s5 }
   0x7   :  { %4256 = sst [smem:[#allocation31_spill]] %s4225_s6 }
   0x8   :  { %4257 = sst [smem:[#allocation32_spill]] %s4226_s7 }
   0x9   :  { %4258 = sst [smem:[#allocation33_spill]] %s4227_s8 }
   0xa   :  { %4259 = sst [smem:[#allocation34_spill]] %s4228_s9 }
   0xb   :  { %4260 = sst [smem:[#allocation35_spill]] %s4229_s10 }
   0xc   :  { %4261 = sst [smem:[#allocation36_spill]] %s4230_s11 }
   0xd   :  { %4262 = sst [smem:[#allocation37_spill]] %s4231_s12 }
   0xe   :  { %4263 = sst [smem:[#allocation38_spill]] %s4232_s13 }
   0xf   :  { %4264 = sst [smem:[#allocation39_spill]] %s4233_s14 }
  0x10   :  { %4265 = sst [smem:[#allocation40_spill]] %s4234_s15 }
  0x11   :  { %4266 = sst [smem:[#allocation41_spill]] %s4235_s16 }
  0x12   :  { %4267 = sst [smem:[#allocation42_spill]] %s4236_s17 }
  0x13   :  { %22 = vsyncpa [#allocation5], 0 }
  0x14   :  { %24 = vsyncpa [#allocation5 + $0x1], 0 }
  0x15   :  { %25 = vsyncpa [#allocation8], 0 }
  0x16   :  { %26 = vsyncpa [#allocation11], 0 }
  0x17   :  { %27 = vsyncpa [#allocation14], 0 }
  0x18   :  { %28 = vsyncpa [#allocation6], 0 }
  0x19   :  { %30 = vsyncpa [#allocation6 + $0x1], 0  ;;  %s3673_s24 = smov 0   ;;  %s3675_s25 = smov 0  }
  0x1a   :  { %s3677_s26 = smov 0   ;;  %s3679_s27 = smov 0  }
  0x1b   :  { %s3681_s28 = smov 0   ;;  %s3683_s29 = smov 0  }
  0x1c   :  { %s3685_s0 = smov 0   ;;  %s3687_s30 = smov 0  }
  0x1d   :  { %s3689_s18 = smov 0   ;;  %s3691_s19 = smov 0  }
  0x1e   :  { %s3693_s1 = smov 0  }
  0x1f LB: > { %4268 = sst [smem:[#allocation22_spill]] %s3549_s19  ;;  %s4238_s20 = sadd.s32 4294967295, %s3553_s1   ;;  %s3553_s1 = sphi %s3693_s1, %s36_s1   ;;  %s3549_s19 = sphi %s3691_s19, %s4306_s19   ;;  %s3545_s18 = sphi %s3689_s18, %s4314_s18   ;;  %s3541_s30 = sphi %s3687_s30, %s4304_s30   ;;  %s3537_s0 = sphi %s3685_s0, %s4313_s0   ;;  %s3533_s29 = sphi %s3683_s29, %s4312_s29   ;;  %s3529_s28 = sphi %s3681_s28, %s4311_s28   ;;  %s3525_s27 = sphi %s3679_s27, %s4310_s27   ;;  %s3521_s26 = sphi %s3677_s26, %s4309_s26   ;;  %s3517_s25 = sphi %s3675_s25, %s4308_s25   ;;  %s3513_s24 = sphi %s3673_s24, %s4307_s24  }
  0x20   : > { %p2745_p0 = scmp.ge.s32.totalorder %s3553_s1, 1  ;;  %p3732_p1 = scmp.eq.s32.totalorder %s4238_s20, 0 }
  0x21   : > { %p453_p2 = scmp.lt.s32.totalorder %s3553_s1, 5  ;;  %s3555_s23 = smov [#allocation7]  }
  0x22   : > { %s4269_s21 = scalar_select %p3732_p1, 1, 0 }
  0x23   : > { %p3737_p3 = pnand %p2745_p0, %p453_p2  ;;  %s469_s17 = sshll.u32 %s3555_s23, 4  ;;  %s470_s17 = int_to_ptr.vmem [resolvable:$true] %s469_s17 }
  0x24   : > { %s3556_s16 = smov [#allocation10]   ;;  %s3557_s14 = smov [#allocation13]  }
  0x25   : > { %s4270_s22 = scalar_select %p3737_p3, 1, 0 }
  0x26   : > { %p3043_p4 = pneg %p3737_p3  ;;  %s493_s15 = sshll.u32 %s3556_s16, 4  ;;  %s494_s15 = int_to_ptr.vmem [resolvable:$true] %s493_s15 }
  0x27   : > { %s517_s12 = sshll.u32 %s3557_s14, 4  ;;  %s3248_s23 = scalar_lea.vmem %s470_s17, 16  ;;  %s3749_s12 = int_to_ptr.vmem [resolvable:$true] %s517_s12 }
  0x28   : > { %p3745_p5 = pnand %p3043_p4, %p3732_p1  ;;  %p3249_p7 = scmp.ne.s32.totalorder %s470_s17, %s3248_s23 }
  0x29   : > { %s3255_s16 = scalar_lea.vmem %s470_s17, 32  ;;  %p3256_p10 = scmp.lt.s32.totalorder %s470_s17, %s470_s17 }
  0x2a   : > { %p3753_p6 = pneg %p3745_p5  ;;  %p3257_p11 = scmp.lt.s32.totalorder %s3255_s16, %s3248_s23 }
  0x2c   : > { %p3251_p8 = pnand %p3249_p7, %p3753_p6  ;;  %p3258_p12 = por %p3257_p11, %p3256_p10 }
  0x2e   : > { %p3252_p9 = pneg %p3251_p8 }
  0x30   : > { %p3259_p13 = pnand %p3258_p12, %p3252_p9 }
  0x32   : > { %3262 = shalt.err (!%p3259_p13)
}
  0x33   : > { %s4273_s4 = sld [smem:[#allocation29_spill]]  ;;  %s3274_s11 = scalar_lea.vmem %s494_s15, 16 }
  0x34   : > { %p3275_p0 = scmp.ne.s32.totalorder %s494_s15, %s3274_s11  ;;  %s3281_s3 = scalar_lea.vmem %s494_s15, 32 }
  0x35   : > { %p3282_p7 = scmp.lt.s32.totalorder %s494_s15, %s494_s15  ;;  %p3283_p8 = scmp.lt.s32.totalorder %s3281_s3, %s3274_s11 }
  0x36   : > { %p3277_p2 = pnand %p3275_p0, %p3753_p6 }
  0x37   : > { %p3284_p3 = por %p3283_p8, %p3282_p7 }
  0x38   : > { %p3278_p4 = pneg %p3277_p2 }
  0x39   : > { %3046 = dma.hbm_to_vmem [thread:$0]  (!%p3745_p5), %s4273_s4, 16, %s470_s17, [#allocation8]  }
  0x3a   : > { %p3285_p1 = pnand %p3284_p3, %p3278_p4 }
  0x3c   : > { %3288 = shalt.err (!%p3285_p1)
}
  0x3d   : > { %s4274_s6 = sld [smem:[#allocation31_spill]]  ;;  %s3300_s13 = scalar_lea.vmem %s3749_s12, 16 }
  0x3e   : > { %p3301_p9 = scmp.ne.s32.totalorder %s3749_s12, %s3300_s13  ;;  %s3307_s3 = scalar_lea.vmem %s3749_s12, 32 }
  0x3f   : > { %p3308_p3 = scmp.lt.s32.totalorder %s3749_s12, %s3749_s12  ;;  %p3309_p1 = scmp.lt.s32.totalorder %s3307_s3, %s3300_s13 }
  0x40   : > { %p3303_p10 = pnand %p3301_p9, %p3753_p6 }
  0x41   : > { %p3310_p12 = por %p3309_p1, %p3308_p3 }
  0x42   : > { %p3304_p11 = pneg %p3303_p10 }
  0x43   : > { %3052 = dma.hbm_to_vmem [thread:$0]  (!%p3745_p5), %s4274_s6, 16, %s494_s15, [#allocation11]  }
  0x44   : > { %p3311_p13 = pnand %p3310_p12, %p3304_p11 }
  0x46   : > { %3314 = shalt.err (!%p3311_p13)
}
  0x47   : > { %s4275_s8 = sld [smem:[#allocation33_spill]]  ;;  %s3558_s15 = smov [#allocation9]  }
  0x48   : > { %s479_s14 = sshll.u32 %s3558_s15, 4  ;;  %s480_s14 = int_to_ptr.vmem [resolvable:$true] %s479_s14 }
  0x49   : > { %s3326_s23 = scalar_lea.vmem %s480_s14, 256  ;;  %p3334_p7 = scmp.lt.s32.totalorder %s480_s14, %s480_s14 }
  0x4a   : > { %p3327_p0 = scmp.ne.s32.totalorder %s480_s14, %s3326_s23  ;;  %p3335_p8 = scmp.lt.s32.totalorder %s3326_s23, %s3326_s23 }
  0x4c   : > { %p3329_p2 = pnand %p3327_p0, %p3753_p6  ;;  %p3336_p9 = por %p3335_p8, %p3334_p7 }
  0x4d   : > { %3058 = dma.hbm_to_vmem [thread:$0]  (!%p3745_p5), %s4275_s8, 16, %s3749_s12, [#allocation14]  }
  0x4e   : > { %p3330_p4 = pneg %p3329_p2 }
  0x50   : > { %p3337_p10 = pnand %p3336_p9, %p3330_p4 }
  0x52   : > { %3340 = shalt.err (!%p3337_p10)
}
  0x53   : > { %s3559_s16 = smov 64   ;;  %s3560_s13 = smov 4  }
  0x54   : > { %s4276_s5 = sld [smem:[#allocation30_spill]]  ;;  %s3561_s11 = smov [#allocation12]  }
  0x55   : > { %s503_s17 = sshll.u32 %s3561_s11, 4  ;;  %s3562_s15 = smov [#allocation15]   ;;  %s504_s17 = int_to_ptr.vmem [resolvable:$true] %s503_s17 }
  0x56   : > { %s528_s4 = sshll.u32 %s3562_s15, 4  ;;  %s3352_s6 = scalar_lea.vmem %s504_s17, 256  ;;  %s529_s4 = int_to_ptr.vmem [resolvable:$true] %s528_s4 }
  0x57   : > { %p3353_p11 = scmp.ne.s32.totalorder %s504_s17, %s3352_s6  ;;  %p3360_p12 = scmp.lt.s32.totalorder %s504_s17, %s504_s17 }
  0x58   : > { %p3361_p13 = scmp.lt.s32.totalorder %s3352_s6, %s3352_s6 }
  0x59   : > { %p3355_p3 = pnand %p3353_p11, %p3753_p6 }
  0x5a   : > { %3049 = dma.hbm_to_vmem [thread:$0]  (!%p3745_p5), %s4276_s5, 256, %s480_s14, [#allocation8], %s3559_s16, %s3559_s16, %s3560_s13  }
  0x5b   : > { %p3356_p1 = pneg %p3355_p3  ;;  %p3362_p0 = por %p3361_p13, %p3360_p12 }
  0x5d   : > { %p3363_p2 = pnand %p3362_p0, %p3356_p1 }
  0x5f   : > { %3366 = shalt.err (!%p3363_p2)
}
  0x60   : > { %s4277_s7 = sld [smem:[#allocation32_spill]]  ;;  %s3378_s3 = scalar_lea.vmem %s529_s4, 16 }
  0x61   : > { %p3379_p4 = scmp.ne.s32.totalorder %s529_s4, %s3378_s3  ;;  %s3385_s12 = scalar_lea.vmem %s529_s4, 32 }
  0x62   : > { %p3386_p9 = scmp.lt.s32.totalorder %s529_s4, %s529_s4  ;;  %p3387_p10 = scmp.lt.s32.totalorder %s3385_s12, %s3378_s3 }
  0x63   : > { %p3381_p7 = pnand %p3379_p4, %p3753_p6 }
  0x64   : > { %p3388_p11 = por %p3387_p10, %p3386_p9 }
  0x65   : > { %p3382_p8 = pneg %p3381_p7 }
  0x66   : > { %3055 = dma.hbm_to_vmem [thread:$0]  (!%p3745_p5), %s4277_s7, 256, %s504_s17, [#allocation11], %s3559_s16, %s3559_s16, %s3560_s13  }
  0x67   : > { %p3389_p3 = pnand %p3388_p11, %p3382_p8 }
  0x69   : > { %3392 = shalt.err (!%p3389_p3)
}
  0x6a   : > { %s4278_s9 = sld [smem:[#allocation34_spill]]  ;;  %s2744_s10 = sadd.s32 4294967294, %s3553_s1  }
  0x6b   : > { %s45_s20 = sadd.s32 1, %s3545_s18  ;;  %s48_s16 = sadd.s32 1, %s3549_s19 }
  0x6c   : > { %p46_p6 = scmp.ge.s32.totalorder %s45_s20, 2  ;;  %s81_s13 = sadd.s32 1, %s3533_s29 }
  0x6d   : > { %p88_p1 = scmp.ne.s32.totalorder %s3533_s29, %s3529_s28  ;;  %p89_p12 = scmp.eq.s32.totalorder %s3553_s1, 0 }
  0x6e   : > { %s4316_s20 = smov (%p46_p6, %s45_s20), 0  ;;  %s4318_s16 = smov (!%p46_p6, %s48_s16), %s3549_s19 }
  0x6f   : > { %4279 = sst [smem:[#allocation23_spill]] %s4316_s20  ;;  %p94_p13 = scmp.ne.s32.totalorder %s3529_s28, %s3525_s27 }
  0x70   : > { %3061 = dma.hbm_to_vmem [thread:$0]  (!%p3745_p5), %s4278_s9, 16, %s529_s4, [#allocation14]  }
  0x71   : > { %p50_p5 = scmp.ge.s32.totalorder %s4318_s16, 2  ;;  %s425_s4 = ssub.s32 %s3545_s18, %s4316_s20 }
  0x72   : > { %p3819_p0 = por %p89_p12, %p88_p1  ;;  %p4281_p2 = scmp.ne.s32.totalorder %s4269_s21, 0 }
  0x73   : > { %s4320_s16 = smov (%p50_p5, %s4318_s16), 0  ;;  %s429_s27 = sadd.s32 1, %s3521_s26 }
  0x74   : > { %p3825_p4 = por %p4281_p2, %p94_p13  ;;  %4283 = sst [smem:[#allocation24_spill]] %s4320_s16 }
  0x75   : > { %p439_p7 = scmp.ne.s32.totalorder %s3521_s26, %s3517_s25  ;;  %s78_s23 = ssub.s32 %s3549_s19, %s4320_s16 }
  0x76   : > { %s4284_s14 = sadd.s32 4294967295, %s3553_s1   ;;  %p79_p9 = scmp.eq.s32.totalorder %s78_s23, 0 }
  0x77   : > { %p440_p8 = scmp.eq.s32.totalorder %s4284_s14, 3  ;;  %s426_s3 = sor.u32 %s425_s4, %s78_s23 }
  0x78   : > { %p427_p10 = scmp.eq.s32.totalorder %s426_s3, 0  ;;  %p445_p3 = scmp.ne.s32.totalorder %s3517_s25, %s3513_s24 }
  0x79   : > { %p3838_p11 = por %p440_p8, %p439_p7  ;;  %p446_p6 = scmp.eq.s32.totalorder %s2744_s10, 3 }
  0x7a   : > { %s3843_s6 = scalar_select %p79_p9, %s3533_s29, %s81_s13  }
  0x7b   : > { %s3846_s11 = scalar_select %p427_p10, %s3521_s26, %s429_s27  }
  0x7c   : > { %p3076_p1 = scmp.lt.s32.totalorder %s3553_s1, 4  ;;  %s567_s5 = sand.u32 1, %s3533_s29  }
  0x7d   : > { %p3852_p12 = por %p446_p6, %p445_p3  ;;  %s2753_s14 = sshll.u32 %s3549_s19, 4 }
  0x7e   : > { %s4287_s23 = sld [smem:[#allocation26_spill]]  ;;  %s570_s9 = scalar_lea.vmem [#allocation4], %s567_s5 }
  0x7f   : > { %s577_s16 = sshll.u32 %s570_s9, 4  ;;  %p3862_p13 = pnand %p3076_p1, %p3819_p0  ;;  %s578_s16 = int_to_ptr.vmem [resolvable:$true] %s577_s16 }
  0x80   : > { %s568_s10 = scalar_lea.sflag [#allocation5], %s567_s5  ;;  %s3406_s27 = scalar_lea.vmem %s578_s16, 16 }
  0x81   : > { %p3395_p5 = pneg %p3862_p13  ;;  %p3407_p2 = scmp.ne.s32.totalorder %s578_s16, %s3406_s27 }
  0x82   : > { %s3563_s20 = smov [#allocation4]  }
  0x83   : > { %p3409_p7 = pnand %p3407_p2, %p3395_p5  ;;  %s3411_s19 = sshll.u32 %s3563_s20, 4  ;;  %s3412_s19 = int_to_ptr.vmem [resolvable:$false] %s3411_s19 }
  0x84   : > { %s575_s3 = scalar_lea.hbm %s4287_s23, %s2753_s14  ;;  %s3413_s8 = scalar_lea.vmem %s3412_s19, 32 }
  0x85   : > { %p3410_p8 = pneg %p3409_p7  ;;  %p3414_p9 = scmp.lt.s32.totalorder %s578_s16, %s3412_s19 }
  0x86   : > { %p3415_p10 = scmp.lt.s32.totalorder %s3413_s8, %s3406_s27 }
  0x88   : > { %p3416_p3 = por %p3415_p10, %p3414_p9 }
  0x8a   : > { %p3417_p6 = pnand %p3416_p3, %p3410_p8 }
  0x8c   : > { %3420 = shalt.err (!%p3417_p6)
}
  0x8d   : > { %3065 = dma.hbm_to_vmem [thread:$0]  (!%p3862_p13), %s575_s3, 16, %s578_s16, %s568_s10  }
  0x8e   : > { %p4289_p0 = scmp.ne.s32.totalorder %s4270_s22, 0 }
  0x8f   : > { %s596_s5 = sand.u32 (!%p4289_p0), 1, %s3529_s28  }
  0x90   : > { %594 = sbr.rel (%p4289_p0) target bundleno = 2843 (0xb1b), region = 88  ;;  %s597_s9 = scalar_lea.sflag (!%p4289_p0), [#allocation5], %s596_s5 }
  0x91   : > { %s3873_s17 = scalar_lea.vmem (!%p4289_p0), [#allocation4], %s596_s5 }
  0x95   : > { %3492 = dma.done.wait (%p3825_p4), %s597_s9, 16  }
  0x96   : > { %3494 = vsyncadd (%p3825_p4), %s597_s9, 4294967280  ;;  %p4290_p1 = scmp.ne.s32.totalorder %s4269_s21, 0 }
  0x98   : > { %3496 = dma.done.wait (%p4290_p1), [#allocation8], 272  }
  0x99   : > { %3498 = vsyncadd (%p4290_p1), [#allocation8], 4294967024 }
  0x9a   : > { %3500 = dma.done.wait (%p4290_p1), [#allocation11], 272  }
  0x9b   : > { %3502 = vsyncadd (%p4290_p1), [#allocation11], 4294967024 }
  0x9c   : > { %3504 = dma.done.wait (%p4290_p1), [#allocation14], 32  }
  0x9d   : > { %3506 = vsyncadd (%p4290_p1), [#allocation14], 4294967264  ;;  %s4248_s19 = sand.u32 1, %s3517_s25   ;;  %p682_p4 = scmp.lt.s32.totalorder %s3537_s0, 1 }
  0x9e   : > { %s3895_s22 = sshll.u32 %s4248_s19, 2  ;;  %p686_p13 = scmp.lt.s32.totalorder %s3541_s30, 1 }
  0x9f   : > { %s683_s20 = scalar_select %p682_p4, %s3537_s0, 1 }
  0xa0   : > { %s687_s16 = scalar_select %p686_p13, %s3541_s30, 1 }
  0xa1   : > { %s2762_s15 = sshll.u32 %s683_s20, 3  ;;  %s4291_s21 = sld [smem:[#allocation25_spill]] }
  0xa2   : > { %s2852_s3 = sshll.u32 %s687_s16, 3  ;;  %s4292_s2 = sld [smem:[#allocation27_spill]] }
  0xa3   : > { %s681_s8 = scalar_lea.vmem [#allocation16], %s3895_s22  ;;  %p2765_p5 = scmp.ne.s32.totalorder %s3537_s0, 0 }
  0xa4   : > { %s3566_s5 = smov (!%p2765_p5), 112   ;;  %s3567_s9 = smov (!%p2765_p5), 120  }
  0xa5   : > { %695 = sbr.rel (%p2765_p5) target bundleno = 550 (0x226), region = 120  ;;  %s3568_s20 = smov (!%p2765_p5), 104  }
  0xa6   : > { %s3569_s16 = smov (!%p2765_p5), 96   ;;  %s3571_s14 = smov (!%p2765_p5), 80  }
  0xa7   : > { %s3903_s23 = scalar_lea.vmem %s4291_s21, %s2762_s15  ;;  %s3570_s15 = smov (!%p2765_p5), 88  }
  0xa8   : > { %s3908_s27 = scalar_lea.vmem %s4292_s2, %s2852_s3  ;;  %s3572_s4 = smov (!%p2765_p5), 72  }
  0xaa   : > { %v3198_v0 = vld [vmem:[#allocation9 + $0x8] sm:$0xff]   ;;  %v3564_v1 = vmov 0.0   ;;  %v3199_v2 = vld [vmem:[#allocation9] sm:$0xff]   ;;  %vm3565_vm0 = vmmov 0   ;;  %vm726_vm1 = vcmask 261120   ;;  %v820_v13 = vlaneseq }
  0xab   : > { %2907 = vmatprep.subr.bf16.mxu0 %v3564_v1  ;;  %2911 = vmatprep.mubr.msk.bf16.mxu0 %vm3565_vm0, %v3564_v1  ;;  %v3200_v3 = vld [vmem:[%s3908_s27] sm:$0xff]   ;;  %v2766_v4 = vld [vmem:[#allocation10] ss:$0 sm:$0xff]  ;;  %v3573_v11 = vmov 1983009808   ;;  %vm1395_vm2 = vcmask 60416  }
  0xac   : > { %2908 = vmatpush3.bf16.msra.mxu0 %v3198_v0  ;;  %v818_v12 = vunpack.c.l.s4 %v3573_v11  ;;  %v3574_v14 = vmov 1934713408   ;;  %v821_v17 = vshrl.u32 %v820_v13, 7 }
  0xad   : > { %2909 = vmatprep.subr.bf16.mxu0 %v3564_v1  ;;  %v882_v15 = vunpack.c.l.s4 %v3574_v14 }
  0xae   : > { %v819_v16 = vunpack.c.0.s8 %v818_v12 }
  0xaf   : > { %v883_v20 = vunpack.c.0.s8 %v882_v15 }
  0xb0   : > { %2910 = vmatpush3.bf16.msra.mxu0 %v3199_v2  ;;  %v3922_v21 = vsub.s32 %v819_v16, %v821_v17 }
  0xb1   : > { %v3924_v28 = vsub.s32 %v883_v20, %v821_v17 }
  0xb3   : > { %2912 = vmatmul.mubr.msk.bf16.vlgmr.msra.gmra.mxu0 %vm726_vm1, %v3200_v3 }
 0x173   : > { %v764_v5 = vpop.f32.mrf.mxu0 }
 0x174   : > { %v765_v6 = vadd.f32 %v2766_v4, %v764_v5 }
 0x175   : > { %v2913_v7 = vpop.f32.mrf.mxu0 }
 0x176   : > { %779 = vrot.lane.b32.xlu1 %v765_v6, %s3566_s5  ;;  %773 = vrot.lane.b32.xlu0 %v765_v6, %s3567_s9 }
 0x177   : > { %v767_v8 = vpop.f32.mrf.mxu0 }
 0x178   : > { %v3913_v9 = vadd.f32 %v2766_v4, %v767_v8 }
 0x179   : > { %v2914_v10 = vpop.f32.mrf.mxu0 }
 0x17a   : > { %785 = vrot.lane.b32.xlu0 %v765_v6, %s3568_s20  ;;  %781 = vrot.lane.b32.xlu1 %v3913_v9, %s3566_s5 }
 0x17e   : > { %791 = vrot.lane.b32.xlu0 %v765_v6, %s3569_s16  ;;  %787 = vrot.lane.b32.xlu1 %v3913_v9, %s3568_s20 }
 0x182   : > { %797 = vrot.lane.b32.xlu0 %v765_v6, %s3570_s15  ;;  %793 = vrot.lane.b32.xlu1 %v3913_v9, %s3569_s16 }
 0x186   : > { %803 = vrot.lane.b32.xlu0 %v765_v6, %s3571_s14  ;;  %799 = vrot.lane.b32.xlu1 %v3913_v9, %s3570_s15 }
 0x18a   : > { %805 = vrot.lane.b32.xlu1 %v3913_v9, %s3571_s14  ;;  %775 = vrot.lane.b32.xlu0 %v3913_v9, %s3567_s9 }
 0x18e   : > { %811 = vrot.lane.b32.xlu1 %v3913_v9, %s3572_s4  ;;  %809 = vrot.lane.b32.xlu0 %v765_v6, %s3572_s4 }
 0x1e8   : > { %v780_v18 = vpop.permute.xlu1 %779  ;;  %v774_v19 = vpop.permute.xlu0 %773 }
 0x1e9   : > { %v815_v22 = vcombine.low %v765_v6, %v780_v18  ;;  %v816_v23 = vcombine.high %v765_v6, %v780_v18 }
 0x1eb   : > { %v823_v29 = vrot.slane %v815_v22, %v3922_v21  ;;  %v830_v30 = vrot.slane %v816_v23, %v3922_v21 }
 0x1ec   : > { %v786_v24 = vpop.permute.xlu0 %785  ;;  %v782_v25 = vpop.permute.xlu1 %781 }
 0x1ed   : > { %v831_v26 = vcombine.low %v774_v19, %v786_v24  ;;  %v832_v27 = vcombine.high %v774_v19, %v786_v24  ;;  %v951_v53 = vcombine.low %v3913_v9, %v782_v25  ;;  %v952_v54 = vcombine.high %v3913_v9, %v782_v25 }
 0x1ef   : > { %v839_v31 = vrot.slane %v831_v26, %v3922_v21  ;;  %v846_v32 = vrot.slane %v832_v27, %v3922_v21  ;;  %v959_v3 = vrot.slane %v951_v53, %v3922_v21  ;;  %v966_v4 = vrot.slane %v952_v54, %v3922_v21 }
 0x1f0   : > { %v792_v33 = vpop.permute.xlu0 %791  ;;  %v788_v34 = vpop.permute.xlu1 %787 }
 0x1f1   : > { %v879_v35 = vcombine.low %v823_v29, %v839_v31  ;;  %v880_v36 = vcombine.high %v823_v29, %v839_v31  ;;  %v895_v37 = vcombine.low %v830_v30, %v846_v32  ;;  %v896_v38 = vcombine.high %v830_v30, %v846_v32 }
 0x1f3   : > { %v887_v39 = vrot.slane %v879_v35, %v3924_v28  ;;  %v894_v40 = vrot.slane %v880_v36, %v3924_v28  ;;  %v903_v41 = vrot.slane %v895_v37, %v3924_v28  ;;  %v910_v42 = vrot.slane %v896_v38, %v3924_v28 }
 0x1f4   : > { %v3934_v43 = vpop.permute.xlu0 %797  ;;  %v794_v44 = vpop.permute.xlu1 %793 }
 0x1f5   : > { %v2771_v45 = vcombine.low %v887_v39, %v894_v40  ;;  %v2773_v46 = vcombine.high %v887_v39, %v894_v40  ;;  %v2775_v47 = vcombine.low %v903_v41, %v910_v42  ;;  %v2777_v48 = vcombine.high %v903_v41, %v910_v42 }
 0x1f7   : > { %v1095_v49 = vrot.slane %v2771_v45, %v3922_v21  ;;  %v1111_v50 = vrot.slane %v2773_v46, %v3922_v21  ;;  %v1127_v51 = vrot.slane %v2775_v47, %v3922_v21  ;;  %v1143_v52 = vrot.slane %v2777_v48, %v3922_v21 }
 0x1f8   : > { %v804_v55 = vpop.permute.xlu0 %803  ;;  %v800_v56 = vpop.permute.xlu1 %799 }
 0x1f9   : > { %v1151_v57 = vcombine.low %v1095_v49, %v1111_v50  ;;  %v1152_v58 = vcombine.high %v1095_v49, %v1111_v50  ;;  %v1183_v59 = vcombine.low %v1127_v51, %v1143_v52  ;;  %v1184_v60 = vcombine.high %v1127_v51, %v1143_v52 }
 0x1fa   : > { %v847_v61 = vcombine.low %v792_v33, %v804_v55  ;;  %v848_v62 = vcombine.high %v792_v33, %v804_v55 }
 0x1fb   : > { %v1159_v63 = vrot.slane %v1151_v57, %v3924_v28  ;;  %v1166_v0 = vrot.slane %v1152_v58, %v3924_v28  ;;  %v1191_v1 = vrot.slane %v1183_v59, %v3924_v28  ;;  %v1198_v2 = vrot.slane %v1184_v60, %v3924_v28 }
 0x1fc   : > { %v3949_v5 = vrot.slane %v847_v61, %v3922_v21  ;;  %v3952_v6 = vrot.slane %v848_v62, %v3922_v21  ;;  %v806_v7 = vpop.permute.xlu1 %805  ;;  %v776_v8 = vpop.permute.xlu0 %775 }
 0x1fd   : > { %v1215_v9 = vcombine.low %v1159_v63, %v1191_v1  ;;  %v1216_v10 = vcombine.high %v1159_v63, %v1191_v1  ;;  %v1217_v11 = vcombine.low %v1166_v0, %v1198_v2  ;;  %v1218_v12 = vcombine.high %v1166_v0, %v1198_v2 }
 0x1fe   : > { %v983_v13 = vcombine.low %v794_v44, %v806_v7  ;;  %v984_v14 = vcombine.high %v794_v44, %v806_v7  ;;  %v967_v15 = vcombine.low %v776_v8, %v788_v34  ;;  %v968_v16 = vcombine.high %v776_v8, %v788_v34 }
 0x1ff   : > { %v2853_v17 = vpack.c.bf16 %v1215_v9, %v1215_v9  ;;  %v2855_v18 = vpack.c.bf16 %v1216_v10, %v1216_v10  ;;  %v2857_v19 = vpack.c.bf16 %v1217_v11, %v1217_v11  ;;  %v2859_v20 = vpack.c.bf16 %v1218_v12, %v1218_v12 }
 0x200   : > { %v991_v22 = vrot.slane %v983_v13, %v3922_v21  ;;  %v998_v23 = vrot.slane %v984_v14, %v3922_v21  ;;  %v975_v24 = vrot.slane %v967_v15, %v3922_v21  ;;  %v982_v25 = vrot.slane %v968_v16, %v3922_v21  ;;  %v812_v26 = vpop.permute.xlu1 %811  ;;  %v810_v27 = vpop.permute.xlu0 %809 }
 0x201   : > { %1396 = vst.msk [vmem:[#allocation2] sm:$0xf] %vm1395_vm2, %v2853_v17  ;;  %1398 = vst.msk [vmem:[#allocation2 + $0x8] sm:$0xf] %vm1395_vm2, %v2855_v18  ;;  %v999_v29 = vcombine.low %v800_v56, %v812_v26  ;;  %v1000_v30 = vcombine.high %v800_v56, %v812_v26  ;;  %v863_v31 = vcombine.low %v3934_v43, %v810_v27 }
 0x202   : > { %1400 = vst.msk [vmem:[#allocation2 + $0x10] sm:$0xf] %vm1395_vm2, %v2857_v19  ;;  %1402 = vst.msk [vmem:[#allocation2 + $0x18] sm:$0xf] %vm1395_vm2, %v2859_v20  ;;  %v864_v32 = vcombine.high %v3934_v43, %v810_v27  ;;  %v1015_v33 = vcombine.low %v959_v3, %v975_v24  ;;  %v1016_v34 = vcombine.high %v959_v3, %v975_v24 }
 0x203   : > { %v1031_v35 = vcombine.low %v966_v4, %v982_v25  ;;  %v1032_v36 = vcombine.high %v966_v4, %v982_v25  ;;  %v1007_v37 = vrot.slane %v999_v29, %v3922_v21  ;;  %v1014_v38 = vrot.slane %v1000_v30, %v3922_v21 }
 0x204   : > { %v3967_v39 = vrot.slane %v863_v31, %v3922_v21  ;;  %v3970_v40 = vrot.slane %v864_v32, %v3922_v21  ;;  %v1023_v41 = vrot.slane %v1015_v33, %v3924_v28  ;;  %v1030_v42 = vrot.slane %v1016_v34, %v3924_v28 }
 0x205   : > { %v1039_v43 = vrot.slane %v1031_v35, %v3924_v28  ;;  %v1046_v44 = vrot.slane %v1032_v36, %v3924_v28  ;;  %v1047_v45 = vcombine.low %v991_v22, %v1007_v37  ;;  %v1048_v46 = vcombine.high %v991_v22, %v1007_v37 }
 0x206   : > { %v1063_v47 = vcombine.low %v998_v23, %v1014_v38  ;;  %v1064_v48 = vcombine.high %v998_v23, %v1014_v38  ;;  %v2779_v49 = vcombine.low %v1023_v41, %v1030_v42  ;;  %v2781_v50 = vcombine.high %v1023_v41, %v1030_v42 }
 0x207   : > { %v2783_v51 = vcombine.low %v1039_v43, %v1046_v44  ;;  %v2785_v52 = vcombine.high %v1039_v43, %v1046_v44  ;;  %v1055_v53 = vrot.slane %v1047_v45, %v3924_v28  ;;  %v1062_v54 = vrot.slane %v1048_v46, %v3924_v28 }
 0x208   : > { %v1071_v55 = vrot.slane %v1063_v47, %v3924_v28  ;;  %v1078_v56 = vrot.slane %v1064_v48, %v3924_v28  ;;  %v1231_v57 = vrot.slane %v2779_v49, %v3922_v21  ;;  %v1247_v58 = vrot.slane %v2781_v50, %v3922_v21 }
 0x209   : > { %v1263_v59 = vrot.slane %v2783_v51, %v3922_v21  ;;  %v1279_v60 = vrot.slane %v2785_v52, %v3922_v21  ;;  %v2780_v61 = vcombine.low %v1055_v53, %v1062_v54  ;;  %v2782_v62 = vcombine.high %v1055_v53, %v1062_v54 }
 0x20a   : > { %v2784_v63 = vcombine.low %v1071_v55, %v1078_v56  ;;  %v2786_v0 = vcombine.high %v1071_v55, %v1078_v56  ;;  %v1287_v1 = vcombine.low %v1231_v57, %v1247_v58  ;;  %v1288_v2 = vcombine.high %v1231_v57, %v1247_v58 }
 0x20b   : > { %v1319_v3 = vcombine.low %v1263_v59, %v1279_v60  ;;  %v1320_v4 = vcombine.high %v1263_v59, %v1279_v60  ;;  %v1238_v7 = vrot.slane %v2780_v61, %v3922_v21  ;;  %v1254_v8 = vrot.slane %v2782_v62, %v3922_v21 }
 0x20c   : > { %v1270_v9 = vrot.slane %v2784_v63, %v3922_v21  ;;  %v1286_v10 = vrot.slane %v2786_v0, %v3922_v21  ;;  %v1295_v11 = vrot.slane %v1287_v1, %v3924_v28  ;;  %v1302_v12 = vrot.slane %v1288_v2, %v3924_v28 }
 0x20d   : > { %v1327_v13 = vrot.slane %v1319_v3, %v3924_v28  ;;  %v1334_v14 = vrot.slane %v1320_v4, %v3924_v28  ;;  %v1303_v15 = vcombine.low %v1238_v7, %v1254_v8  ;;  %v1304_v16 = vcombine.high %v1238_v7, %v1254_v8 }
 0x20e   : > { %v1335_v17 = vcombine.low %v1270_v9, %v1286_v10  ;;  %v1336_v18 = vcombine.high %v1270_v9, %v1286_v10  ;;  %v911_v37 = vcombine.low %v3949_v5, %v3967_v39  ;;  %v912_v38 = vcombine.high %v3949_v5, %v3967_v39 }
 0x20f   : > { %v1351_v19 = vcombine.low %v1295_v11, %v1327_v13  ;;  %v1352_v20 = vcombine.high %v1295_v11, %v1327_v13  ;;  %v1353_v22 = vcombine.low %v1302_v12, %v1334_v14  ;;  %v1354_v23 = vcombine.high %v1302_v12, %v1334_v14 }
 0x210   : > { %v1311_v24 = vrot.slane %v1303_v15, %v3924_v28  ;;  %v1318_v25 = vrot.slane %v1304_v16, %v3924_v28  ;;  %v1343_v26 = vrot.slane %v1335_v17, %v3924_v28  ;;  %v1350_v27 = vrot.slane %v1336_v18, %v3924_v28 }
 0x211   : > { %v2854_v29 = vpack.c.bf16 %v1351_v19, %v1351_v19  ;;  %v2856_v30 = vpack.c.bf16 %v1352_v20, %v1352_v20  ;;  %v2858_v31 = vpack.c.bf16 %v1353_v22, %v1353_v22  ;;  %v2860_v32 = vpack.c.bf16 %v1354_v23, %v1354_v23 }
 0x212   : > { %v1355_v33 = vcombine.low %v1311_v24, %v1343_v26  ;;  %v1356_v34 = vcombine.high %v1311_v24, %v1343_v26  ;;  %v1357_v35 = vcombine.low %v1318_v25, %v1350_v27  ;;  %v1358_v36 = vcombine.high %v1318_v25, %v1350_v27 }
 0x213   : > { %1397 = vst.msk [vmem:[#allocation2 + $0x4] sm:$0xf] %vm1395_vm2, %v2854_v29  ;;  %1399 = vst.msk [vmem:[#allocation2 + $0xc] sm:$0xf] %vm1395_vm2, %v2856_v30  ;;  %v927_v41 = vcombine.low %v3952_v6, %v3970_v40  ;;  %v928_v42 = vcombine.high %v3952_v6, %v3970_v40  ;;  %v919_v47 = vrot.slane %v911_v37, %v3924_v28 }
 0x214   : > { %1401 = vst.msk [vmem:[#allocation2 + $0x14] sm:$0xf] %vm1395_vm2, %v2858_v31  ;;  %1403 = vst.msk [vmem:[#allocation2 + $0x1c] sm:$0xf] %vm1395_vm2, %v2860_v32  ;;  %v2862_v43 = vpack.c.bf16 %v1355_v33, %v1355_v33  ;;  %v2864_v44 = vpack.c.bf16 %v1356_v34, %v1356_v34  ;;  %v2866_v45 = vpack.c.bf16 %v1357_v35, %v1357_v35 }
 0x215   : > { %v2868_v46 = vpack.c.bf16 %v1358_v36, %v1358_v36  ;;  %v926_v48 = vrot.slane %v912_v38, %v3924_v28  ;;  %v935_v49 = vrot.slane %v927_v41, %v3924_v28  ;;  %v942_v50 = vrot.slane %v928_v42, %v3924_v28 }
 0x216   : > { %1433 = vst.msk [vmem:[#allocation3 + $0x4] sm:$0xf] %vm1395_vm2, %v2862_v43  ;;  %1435 = vst.msk [vmem:[#allocation3 + $0xc] sm:$0xf] %vm1395_vm2, %v2864_v44 }
 0x217   : > { %1437 = vst.msk [vmem:[#allocation3 + $0x14] sm:$0xf] %vm1395_vm2, %v2866_v45  ;;  %1439 = vst.msk [vmem:[#allocation3 + $0x1c] sm:$0xf] %vm1395_vm2, %v2868_v46  ;;  %v2772_v5 = vcombine.low %v919_v47, %v926_v48  ;;  %v2774_v6 = vcombine.high %v919_v47, %v926_v48  ;;  %v2776_v39 = vcombine.low %v935_v49, %v942_v50 }
 0x218   : > { %v2778_v40 = vcombine.high %v935_v49, %v942_v50 }
 0x219   : > { %v1102_v51 = vrot.slane %v2772_v5, %v3922_v21  ;;  %v1118_v52 = vrot.slane %v2774_v6, %v3922_v21  ;;  %v1134_v53 = vrot.slane %v2776_v39, %v3922_v21 }
 0x21a   : > { %v1150_v54 = vrot.slane %v2778_v40, %v3922_v21 }
 0x21b   : > { %v1167_v55 = vcombine.low %v1102_v51, %v1118_v52  ;;  %v1168_v56 = vcombine.high %v1102_v51, %v1118_v52 }
 0x21c   : > { %v1199_v57 = vcombine.low %v1134_v53, %v1150_v54  ;;  %v1200_v58 = vcombine.high %v1134_v53, %v1150_v54 }
 0x21d   : > { %v1175_v59 = vrot.slane %v1167_v55, %v3924_v28  ;;  %v1182_v60 = vrot.slane %v1168_v56, %v3924_v28 }
 0x21e   : > { %v1207_v61 = vrot.slane %v1199_v57, %v3924_v28  ;;  %v1214_v62 = vrot.slane %v1200_v58, %v3924_v28 }
 0x220   : > { %v1219_v63 = vcombine.low %v1175_v59, %v1207_v61  ;;  %v1220_v0 = vcombine.high %v1175_v59, %v1207_v61  ;;  %v1221_v1 = vcombine.low %v1182_v60, %v1214_v62  ;;  %v1222_v2 = vcombine.high %v1182_v60, %v1214_v62 }
 0x222   : > { %v2861_v3 = vpack.c.bf16 %v1219_v63, %v1219_v63  ;;  %v2863_v4 = vpack.c.bf16 %v1220_v0, %v1220_v0  ;;  %v2865_v7 = vpack.c.bf16 %v1221_v1, %v1221_v1  ;;  %v2867_v21 = vpack.c.bf16 %v1222_v2, %v1222_v2 }
 0x224   : > { %1432 = vst.msk [vmem:[#allocation3] sm:$0xf] %vm1395_vm2, %v2861_v3  ;;  %1434 = vst.msk [vmem:[#allocation3 + $0x8] sm:$0xf] %vm1395_vm2, %v2863_v4 }
 0x225   : > { %1436 = vst.msk [vmem:[#allocation3 + $0x10] sm:$0xf] %vm1395_vm2, %v2865_v7  ;;  %1438 = vst.msk [vmem:[#allocation3 + $0x18] sm:$0xf] %vm1395_vm2, %v2867_v21 }
 0x226 PF: > { %s4293_s13 = sld [smem:[#allocation28_spill]]  ;;  %v3575_v8 = vmov 0.0   ;;  %vm3576_vm3 = vmmov 0   ;;  %s2803_s9 = sshll.u32 %s3537_s0, 3  ;;  %vm1469_vm4 = vcmask 261120   ;;  %v3203_v16 = vld [vmem:[#allocation2] sm:$0xff]   ;;  %v1528_v24 = vlaneseq }
 0x227   : > { %2915 = vmatprep.subr.bf16.mxu1 %v3575_v8  ;;  %2929 = vmatprep.subr.bf16.mxu0 %v3575_v8  ;;  %s1441_s20 = sshra.s32 %s2803_s9, 3  ;;  %v2805_v11 = vld [vmem:[#allocation7] ss:$0 sm:$0xff]  ;;  %s3577_s14 = smov 104   ;;  %v3204_v17 = vld [vmem:[#allocation2 + $0x8] sm:$0xff]   ;;  %vm1677_vm5 = vcmask 64512  }
 0x228   : > { %2919 = vmatprep.mubr.msk.bf16.mxu1 %vm3576_vm3, %v3575_v8  ;;  %2931 = vmatprep.mubr.msk.bf16.mxu0 %vm3576_vm3, %v3575_v8  ;;  %s2804_s16 = sshll.u32 %s1441_s20, 2  ;;  %s3578_s4 = smov 120   ;;  %v1682_v19 = vsel %vm1677_vm5, %v3203_v16, 0  ;;  %v1733_v20 = vsel %vm1677_vm5, %v3204_v17, 0  ;;  %v3580_v22 = vmov 1983009808  }
 0x229   : > { %s1444_s15 = scalar_lea.vmem %s3908_s27, %s2804_s16  ;;  %s3579_s27 = smov 112   ;;  %2930 = vmatpush3.bf16.xpose.msra.mxu0 %v1733_v20  ;;  %v1526_v23 = vunpack.c.l.s4 %v3580_v22  ;;  %v3581_v25 = vmov 1934713408   ;;  %v1529_v29 = vshrl.u32 %v1528_v24, 7  ;;  %v3205_v60 = vld [vmem:[#allocation2 + $0x10] sm:$0xff]   ;;  %v3206_v61 = vld [vmem:[#allocation2 + $0x18] sm:$0xff]  }
 0x22a   : > { %v4043_v10 = vld [vmem:[%s1444_s15] sm:$0xf]  ;;  %2941 = vmatprep.subr.bf16.mxu0 %v3575_v8  ;;  %v1558_v26 = vunpack.c.l.s4 %v3581_v25  ;;  %v1784_v4 = vsel %vm1677_vm5, %v3205_v60, 0  ;;  %v1835_v7 = vsel %vm1677_vm5, %v3206_v61, 0  ;;  %vm1888_vm6 = vcmask 130048   ;;  %s4294_s21 = sld [smem:[#allocation36_spill]] }
 0x22b   : > { %v1527_v27 = vunpack.c.0.s8 %v1526_v23  ;;  %v1671_v16 = vld [vmem:[%s3903_s23] sm:$0xff]  ;;  %vm2151_vm7 = vcmask 1043456   ;;  %s4295_s20 = sld [smem:[#allocation38_spill]]  ;;  %vm2487_vm8 = vcmask 523264   ;;  %vm2562_vm9 = vcmask 257024   ;;  %s3582_s23 = smov [#allocation16]  }
 0x22c   : > { %v3201_v28 = vld [vmem:[%s4293_s13 + $0x8] sm:$0xff]   ;;  %v3202_v9 = vld [vmem:[%s4293_s13] sm:$0xff]   ;;  %v1559_v32 = vunpack.c.0.s8 %v1558_v26  ;;  %s4297_s16 = sld [smem:[#allocation37_spill]] }
 0x22d   : > { %2916 = vmatpush3.bf16.msra.mxu1 %v3201_v28  ;;  %v1530_v33 = vsub.s32 %v1527_v27, %v1529_v29  ;;  %s4299_s3 = sld [smem:[#allocation40_spill]] }
 0x22e   : > { %2917 = vmatprep.subr.bf16.mxu1 %v3575_v8  ;;  %v1562_v41 = vsub.s32 %v1559_v32, %v1529_v29  ;;  %s4301_s19 = sld [smem:[#allocation42_spill]] }
 0x231   : > { %2918 = vmatpush3.bf16.msra.mxu1 %v3202_v9 }
 0x232   : > { %2923 = vmatprep.subr.bf16.mxu1 %v3575_v8 }
 0x234   : > { %2920 = vmatmul.mubr.msk.bf16.vlgmr.msra.gmra.mxu1 %vm1469_vm4, %v4043_v10  ;;  %s4302_s2 = smov %s4301_s19 }
 0x235   : > { %2925 = vmatprep.mubr.msk.bf16.mxu1 %vm3576_vm3, %v3575_v8  ;;  %2924 = vmatpush3.bf16.xpose.msra.mxu1 %v1682_v19  ;;  %v2819_v19 = vld [vmem:[%s3873_s17] ss:$0 sm:$0xff]  ;;  %s4303_s17 = sand.u32 1, %s3517_s25  }
 0x236   : > { %2935 = vmatprep.subr.bf16.mxu1 %v3575_v8 }
 0x2f4   : > { %v1507_v12 = vpop.f32.mrf.mxu1 }
 0x2f5   : > { %v1508_v13 = vadd.f32 %v2805_v11, %v1507_v12 }
 0x2f6   : > { %v2921_v14 = vpop.f32.mrf.mxu1 }
 0x2f7   : > { %1520 = vrot.lane.b32.xlu1 %v1508_v13, %s3577_s14  ;;  %1514 = vrot.lane.b32.xlu0 %v1508_v13, %s3578_s4  ;;  %s4298_s4 = sld [smem:[#allocation39_spill]]  ;;  %s2580_s14 = sshll.u32 %s681_s8, 4  ;;  %s2581_s14 = int_to_ptr.vmem [resolvable:$true] %s2580_s14 }
 0x2f8   : > { %v1510_v15 = vpop.f32.mrf.mxu1 }
 0x2fa   : > { %v2922_v18 = vpop.f32.mrf.mxu1 }
 0x2fb   : > { %1517 = vrot.lane.b32.xlu0 %v1508_v13, %s3579_s27  ;;  %s4296_s27 = sld [smem:[#allocation35_spill]] }
 0x369   : > { %v1521_v30 = vpop.permute.xlu1 %1520  ;;  %v1515_v31 = vpop.permute.xlu0 %1514 }
 0x36a   : > { %v1539_v34 = vcombine.low %v1515_v31, %v1521_v30  ;;  %v1540_v35 = vcombine.high %v1515_v31, %v1521_v30 }
 0x36c   : > { %v1547_v42 = vrot.slane %v1539_v34, %v1530_v33  ;;  %v1554_v43 = vrot.slane %v1540_v35, %v1530_v33 }
 0x36d   : > { %v1518_v36 = vpop.permute.xlu0 %1517 }
 0x36e   : > { %v1523_v37 = vcombine.low %v1508_v13, %v1518_v36  ;;  %v1524_v38 = vcombine.high %v1508_v13, %v1518_v36 }
 0x370   : > { %v1531_v44 = vrot.slane %v1523_v37, %v1530_v33  ;;  %v1538_v45 = vrot.slane %v1524_v38, %v1530_v33 }
 0x372   : > { %v1555_v46 = vcombine.low %v1531_v44, %v1547_v42  ;;  %v1556_v47 = vcombine.high %v1531_v44, %v1547_v42  ;;  %v1571_v48 = vcombine.low %v1538_v45, %v1554_v43  ;;  %v1572_v49 = vcombine.high %v1538_v45, %v1554_v43 }
 0x374   : > { %v1563_v50 = vrot.slane %v1555_v46, %v1562_v41  ;;  %v1570_v5 = vrot.slane %v1556_v47, %v1562_v41  ;;  %v1579_v6 = vrot.slane %v1571_v48, %v1562_v41  ;;  %v1586_v39 = vrot.slane %v1572_v49, %v1562_v41 }
 0x376   : > { %v1591_v40 = vcombine.low %v1563_v50, %v1570_v5  ;;  %v2809_v51 = vcombine.high %v1563_v50, %v1570_v5  ;;  %v1607_v52 = vcombine.low %v1579_v6, %v1586_v39  ;;  %v2810_v53 = vcombine.high %v1579_v6, %v1586_v39 }
 0x378   : > { %v1598_v54 = vrot.slane %v1591_v40, %v1530_v33  ;;  %v1606_v55 = vrot.slane %v2809_v51, %v1530_v33  ;;  %v1614_v56 = vrot.slane %v1607_v52, %v1530_v33  ;;  %v1622_v57 = vrot.slane %v2810_v53, %v1530_v33 }
 0x37a   : > { %v1623_v58 = vcombine.low %v1598_v54, %v1606_v55  ;;  %v1639_v59 = vcombine.low %v1614_v56, %v1622_v57  ;;  %v1624_v62 = vcombine.high %v1598_v54, %v1606_v55  ;;  %v1640_v63 = vcombine.high %v1614_v56, %v1622_v57 }
 0x37c   : > { %v1631_v0 = vrot.slane %v1623_v58, %v1562_v41  ;;  %v1647_v1 = vrot.slane %v1639_v59, %v1562_v41  ;;  %v1638_v9 = vrot.slane %v1624_v62, %v1562_v41  ;;  %v1654_v11 = vrot.slane %v1640_v63, %v1562_v41 }
 0x37e   : > { %v1655_v2 = vcombine.low %v1631_v0, %v1647_v1  ;;  %v1656_v3 = vcombine.high %v1631_v0, %v1647_v1  ;;  %v1657_v12 = vcombine.low %v1638_v9, %v1654_v11  ;;  %v1658_v13 = vcombine.high %v1638_v9, %v1654_v11 }
 0x380   : > { %v1659_v21 = vpack.c.bf16 %v1655_v2, %v1655_v2  ;;  %v1660_v28 = vpack.c.bf16 %v1656_v3, %v1656_v3  ;;  %v1661_v14 = vpack.c.bf16 %v1657_v12, %v1657_v12  ;;  %v1662_v15 = vpack.c.bf16 %v1658_v13, %v1658_v13  ;;  %v3207_v2 = vld [vmem:[#allocation3] sm:$0xff]   ;;  %v3208_v3 = vld [vmem:[#allocation3 + $0x8] sm:$0xff]  }
 0x382   : > { %2926 = vmatmul.mubr.msk.bf16.vlgmr.msra.gmra.mxu1 %vm1677_vm5, %v1659_v21  ;;  %2932 = vmatmul.mubr.msk.bf16.vlgmr.msra.gmra.mxu0 %vm1677_vm5, %v1660_v28 }
 0x383   : > { %2936 = vmatpush3.bf16.xpose.msra.mxu1 %v1784_v4  ;;  %2942 = vmatpush3.bf16.xpose.msra.mxu0 %v1835_v7 }
 0x384   : > { %2937 = vmatprep.mubr.msk.bf16.mxu1 %vm3576_vm3, %v3575_v8  ;;  %2943 = vmatprep.mubr.msk.bf16.mxu0 %vm3576_vm3, %v3575_v8 }
 0x385   : > { %2947 = vmatprep.subr.bf16.mxu1 %v3575_v8  ;;  %2953 = vmatprep.subr.bf16.mxu0 %v3575_v8 }
 0x38a   : > { %2938 = vmatmul.mubr.msk.bf16.vlgmr.msra.gmra.mxu1 %vm1677_vm5, %v1661_v14  ;;  %2944 = vmatmul.mubr.msk.bf16.vlgmr.msra.gmra.mxu0 %vm1677_vm5, %v1662_v15  ;;  %v3210_v14 = vld [vmem:[#allocation3 + $0x18] sm:$0xff]  }
 0x38b   : > { %2949 = vmatprep.mubr.msk.bf16.mxu1 %vm3576_vm3, %v3575_v8  ;;  %2955 = vmatprep.mubr.msk.bf16.mxu0 %vm3576_vm3, %v3575_v8 }
 0x38c   : > { %2948 = vmatpush3.bf16.msra.mxu1 %v3207_v2  ;;  %2954 = vmatpush3.bf16.msra.mxu0 %v3208_v3 }
 0x38d   : > { %2959 = vmatprep.subr.bf16.mxu1 %v3575_v8  ;;  %2965 = vmatprep.subr.bf16.mxu0 %v3575_v8 }
 0x442   : > { %v1718_v17 = vpop.f32.mrf.mxu1  ;;  %v1769_v18 = vpop.f32.mrf.mxu0 }
 0x443   : > { %v1719_v20 = vadd.f32 %v1718_v17, %v1671_v16  ;;  %v1770_v22 = vadd.f32 %v1769_v18, %v1671_v16 }
 0x444   : > { %v2927_v23 = vpop.f32.mrf.mxu1  ;;  %v2933_v24 = vpop.f32.mrf.mxu0 }
 0x445   : > { %v1885_v25 = vadd.f32 %v2819_v19, %v1770_v22  ;;  %v1884_v26 = vadd.f32 %v2819_v19, %v1719_v20  ;;  %v2147_v23 = vld [vmem:[#allocation12 + $0x4] sm:$0xf] }
 0x446   : > { %v1721_v27 = vpop.f32.mrf.mxu1  ;;  %v1772_v29 = vpop.f32.mrf.mxu0 }
 0x447   : > { %v1892_v30 = vsel %vm1888_vm6, %v1885_v25, -inf  ;;  %v1889_v31 = vsel %vm1888_vm6, %v1884_v26, -inf  ;;  %v2153_v29 = vsel %vm2151_vm7, %v2147_v23, 0 }
 0x448   : > { %1893 = vmax.xlane.f32.xlu0 %v1892_v30  ;;  %v2934_v32 = vpop.f32.mrf.mxu0  ;;  %1890 = vmax.xlane.f32.xlu1 %v1889_v31  ;;  %v2928_v33 = vpop.f32.mrf.mxu1  ;;  %v2242_v30 = vld [vmem:[#allocation12 + $0x8] sm:$0xf]  ;;  %v2291_v31 = vld [vmem:[#allocation12 + $0xc] sm:$0xf] }
 0x44a   : > { %v1820_v34 = vpop.f32.mrf.mxu1  ;;  %v1871_v35 = vpop.f32.mrf.mxu0 }
 0x44b   : > { %v1821_v36 = vadd.f32 %v1820_v34, %v1671_v16  ;;  %v1872_v37 = vadd.f32 %v1871_v35, %v1671_v16  ;;  %v3209_v16 = vld [vmem:[#allocation3 + $0x10] sm:$0xff]   ;;  %v2247_v35 = vsel %vm2151_vm7, %v2242_v30, 0  ;;  %v2834_v30 = vld [vmem:[%s4296_s27] ss:$0 sm:$0xff]  ;;  %s2848_s27 = sshll.u32 %s3541_s30, 1 }
 0x44c   : > { %v2939_v38 = vpop.f32.mrf.mxu1  ;;  %v2945_v41 = vpop.f32.mrf.mxu0  ;;  %s2576_s10 = sadd.s32 %s3537_s0, %s2848_s27  ;;  %s2565_s0 = scalar_lea.sflag [#allocation6], %s4303_s17 }
 0x44d   : > { %v1887_v42 = vadd.f32 %v2819_v19, %v1872_v37  ;;  %v1886_v43 = vadd.f32 %v2819_v19, %v1821_v36  ;;  %v2145_v19 = vld [vmem:[#allocation12] sm:$0xf]  ;;  %v2296_v38 = vsel %vm2151_vm7, %v2291_v31, 0  ;;  %s2849_s15 = sshll.u32 %s2576_s10, 6  ;;  %s3421_s27 = scalar_lea.vmem %s2581_s14, 64 }
 0x44e   : > { %v1823_v44 = vpop.f32.mrf.mxu1  ;;  %v1874_v45 = vpop.f32.mrf.mxu0  ;;  %s2578_s13 = scalar_lea.hbm %s4301_s19, %s2849_s15  ;;  %p3422_p2 = scmp.ne.s32.totalorder %s2581_s14, %s3421_s27 }
 0x44f   : > { %v1898_v46 = vsel %vm1888_vm6, %v1887_v42, -inf  ;;  %v1895_v47 = vsel %vm1888_vm6, %v1886_v43, -inf }
 0x450   : > { %v2946_v48 = vpop.f32.mrf.mxu0  ;;  %1899 = vmax.xlane.f32.xlu1 %v1898_v46  ;;  %1896 = vmax.xlane.f32.xlu0 %v1895_v47  ;;  %v2940_v49 = vpop.f32.mrf.mxu1  ;;  %p3423_p7 = pnand %p3422_p2, %p3838_p11 }
 0x452   : > { %p3424_p8 = pneg %p3423_p7 }
 0x4d1   : > { %v1894_v50 = vpop.xlane.xlu0 %1893  ;;  %v1891_v5 = vpop.xlane.xlu1 %1890 }
 0x4d2   : > { %v1902_v6 = vsub.f32 %v1885_v25, %v1894_v50  ;;  %v1901_v39 = vsub.f32 %v1884_v26, %v1891_v5  ;;  %v2199_v26 = vsel %vm2151_vm7, %v2145_v19, 0  ;;  %v3212_v19 = vld [vmem:[%s4294_s21] sm:$0xff]  }
 0x4d4   : > { %v1907_v40 = vmul.f32 1.442695, %v1902_v6  ;;  %v1905_v51 = vmul.f32 1.442695, %v1901_v39 }
 0x4d6   : > { %3217 = vpow2.f32 %v1907_v40 }
 0x4d7   : > { %3219 = vpow2.f32 %v1905_v51 }
 0x4d9   : > { %v1900_v52 = vpop.xlane.xlu1 %1899  ;;  %v1897_v53 = vpop.xlane.xlu0 %1896 }
 0x4da   : > { %v1904_v54 = vsub.f32 %v1887_v42, %v1900_v52  ;;  %v1903_v55 = vsub.f32 %v1886_v43, %v1897_v53 }
 0x4dc   : > { %v1911_v56 = vmul.f32 1.442695, %v1904_v54  ;;  %v1909_v57 = vmul.f32 1.442695, %v1903_v55 }
 0x4de   : > { %3221 = vpow2.f32 %v1911_v56 }
 0x4df   : > { %3223 = vpow2.f32 %v1909_v57 }
 0x4e3   : > { %v3218_v58 = vpop.eup %3217 }
 0x4e4   : > { %v3220_v59 = vpop.eup %3219  ;;  %v1916_v60 = vsel %vm1888_vm6, %v3218_v58, 0.0 }
 0x4e5   : > { %1917 = vadd.xlane.f32.xlu1 %v1916_v60  ;;  %v1913_v61 = vsel %vm1888_vm6, %v3220_v59, 0.0 }
 0x4e6   : > { %1914 = vadd.xlane.f32.xlu0 %v1913_v61 }
 0x4eb   : > { %v3222_v62 = vpop.eup %3221 }
 0x4ec   : > { %v3224_v63 = vpop.eup %3223  ;;  %v1922_v0 = vsel %vm1888_vm6, %v3222_v62, 0.0 }
 0x4ed   : > { %1923 = vadd.xlane.f32.xlu1 %v1922_v0  ;;  %v1919_v1 = vsel %vm1888_vm6, %v3224_v63, 0.0  ;;  %v2832_v0 = vld [vmem:[#allocation13] ss:$0 sm:$0xff] }
 0x4ee   : > { %1920 = vadd.xlane.f32.xlu0 %v1919_v1 }
 0x56e   : > { %v1918_v4 = vpop.xlane.xlu1 %1917 }
 0x56f   : > { %3225 = vrcp.f32 %v1918_v4  ;;  %v1915_v7 = vpop.xlane.xlu0 %1914  ;;  %v2347_v4 = vunpack.c.l.bf16 %v4043_v10  ;;  %v3211_v10 = vld [vmem:[%s4294_s21 + $0x8] sm:$0xff]  }
 0x570   : > { %3227 = vrcp.f32 %v1915_v7 }
 0x576   : > { %v1924_v21 = vpop.xlane.xlu1 %1923 }
 0x577   : > { %3229 = vrcp.f32 %v1924_v21  ;;  %v1921_v28 = vpop.xlane.xlu0 %1920 }
 0x578   : > { %3231 = vrcp.f32 %v1921_v28 }
 0x57c   : > { %v3226_v9 = vpop.eup %3225 }
 0x57d   : > { %v3228_v11 = vpop.eup %3227  ;;  %v1930_v12 = vmul.f32 %v3226_v9, %v3218_v58 }
 0x57e   : > { %v1929_v13 = vmul.f32 %v3228_v11, %v3220_v59 }
 0x57f   : > { %v1934_v15 = vpack.c.bf16 %v1930_v12, %v1930_v12 }
 0x580   : > { %v1933_v17 = vpack.c.bf16 %v1929_v13, %v1929_v13 }
 0x581   : > { %2956 = vmatmul.mubr.msk.bf16.vlgmr.msra.gmra.mxu0 %vm1888_vm6, %v1934_v15 }
 0x582   : > { %2950 = vmatmul.mubr.msk.bf16.vlgmr.msra.gmra.mxu1 %vm1888_vm6, %v1933_v17  ;;  %2966 = vmatpush3.bf16.msra.mxu0 %v3210_v14 }
 0x583   : > { %2960 = vmatpush3.bf16.msra.mxu1 %v3209_v16  ;;  %2961 = vmatprep.mubr.msk.bf16.mxu1 %vm3576_vm3, %v3575_v8 }
 0x584   : > { %v3230_v18 = vpop.eup %3229  ;;  %2967 = vmatprep.mubr.msk.bf16.mxu0 %vm3576_vm3, %v3575_v8  ;;  %2971 = vmatprep.subr.bf16.mxu1 %v3575_v8 }
 0x585   : > { %v3232_v20 = vpop.eup %3231  ;;  %v1932_v22 = vmul.f32 %v3230_v18, %v3222_v62  ;;  %2977 = vmatprep.subr.bf16.mxu0 %v3575_v8 }
 0x586   : > { %v1931_v24 = vmul.f32 %v3232_v20, %v3224_v63  ;;  %v3213_v20 = vld [vmem:[%s4295_s20 + $0x18] sm:$0xff]  }
 0x587   : > { %v1936_v25 = vpack.c.bf16 %v1932_v22, %v1932_v22  ;;  %v3214_v22 = vld [vmem:[%s4295_s20 + $0x10] sm:$0xff]  }
 0x588   : > { %v1935_v27 = vpack.c.bf16 %v1931_v24, %v1931_v24 }
 0x589   : > { %2968 = vmatmul.mubr.msk.bf16.vlgmr.msra.gmra.mxu0 %vm1888_vm6, %v1936_v25 }
 0x58a   : > { %2962 = vmatmul.mubr.msk.bf16.vlgmr.msra.gmra.mxu1 %vm1888_vm6, %v1935_v27  ;;  %2978 = vmatpush3.bf16.msra.mxu0 %v2199_v26  ;;  %v2833_v27 = vld [vmem:[#allocation15] ss:$0 sm:$0xff] }
 0x58b   : > { %2972 = vmatpush3.bf16.msra.mxu1 %v2153_v29  ;;  %2973 = vmatprep.mubr.msk.bf16.mxu1 %vm3576_vm3, %v3575_v8 }
 0x58c   : > { %2979 = vmatprep.mubr.msk.bf16.mxu0 %vm3576_vm3, %v3575_v8  ;;  %2983 = vmatprep.subr.bf16.mxu1 %v3575_v8 }
 0x58d   : > { %2989 = vmatprep.subr.bf16.mxu0 %v3575_v8 }
 0x641   : > { %v2037_v32 = vpop.f32.mrf.mxu0 }
 0x642   : > { %v1988_v33 = vpop.f32.mrf.mxu1  ;;  %v2142_v34 = vpack.c.bf16 %v2037_v32, %v2037_v32 }
 0x643   : > { %v2141_v36 = vpack.c.bf16 %v1988_v33, %v1988_v33  ;;  %v2957_v37 = vpop.f32.mrf.mxu0 }
 0x644   : > { %v2951_v41 = vpop.f32.mrf.mxu1  ;;  %2974 = vmatmul.mubr.msk.bf16.vlgmr.msra.gmra.mxu1 %vm1677_vm5, %v2142_v34  ;;  %v3215_v34 = vld [vmem:[%s4295_s20 + $0x8] sm:$0xff]  }
 0x645   : > { %2980 = vmatmul.mubr.msk.bf16.vlgmr.msra.gmra.mxu0 %vm1677_vm5, %v2141_v36  ;;  %2984 = vmatpush3.bf16.msra.mxu1 %v2247_v35  ;;  %v2040_v42 = vpop.f32.mrf.mxu0  ;;  %v3216_v35 = vld [vmem:[%s4295_s20] sm:$0xff]  }
 0x646   : > { %v1991_v43 = vpop.f32.mrf.mxu1  ;;  %2990 = vmatpush3.bf16.msra.mxu0 %v2296_v38  ;;  %2985 = vmatprep.mubr.msk.bf16.mxu1 %vm3576_vm3, %v3575_v8  ;;  %v2835_v36 = vld [vmem:[%s4297_s16] ss:$0 sm:$0xff]  ;;  %s4300_s16 = sld [smem:[#allocation41_spill]] }
 0x647   : > { %v2958_v44 = vpop.f32.mrf.mxu0  ;;  %2991 = vmatprep.mubr.msk.bf16.mxu0 %vm3576_vm3, %v3575_v8  ;;  %2995 = vmatprep.subr.bf16.mxu1 %v3575_v8 }
 0x648   : > { %v2952_v45 = vpop.f32.mrf.mxu1  ;;  %3003 = vmatprep.subr.bf16.mxu0 %v3575_v8 }
 0x649   : > { %v2135_v46 = vpop.f32.mrf.mxu0 }
 0x64a   : > { %v2086_v47 = vpop.f32.mrf.mxu1  ;;  %v2144_v48 = vpack.c.bf16 %v2135_v46, %v2135_v46 }
 0x64b   : > { %v2143_v49 = vpack.c.bf16 %v2086_v47, %v2086_v47  ;;  %v2969_v50 = vpop.f32.mrf.mxu0 }
 0x64c   : > { %v2963_v5 = vpop.f32.mrf.mxu1 }
 0x64d   : > { %2986 = vmatmul.mubr.msk.bf16.vlgmr.msra.gmra.mxu1 %vm1677_vm5, %v2143_v49  ;;  %2992 = vmatmul.mubr.msk.bf16.vlgmr.msra.gmra.mxu0 %vm1677_vm5, %v2144_v48  ;;  %v2138_v6 = vpop.f32.mrf.mxu0 }
 0x64e   : > { %v2089_v39 = vpop.f32.mrf.mxu1  ;;  %2999 = vmatprep.mubr.msk.bf16.mxu1 %vm3576_vm3, %v3575_v8  ;;  %3011 = vmatprep.mubr.msk.bf16.mxu0 %vm3576_vm3, %v3575_v8 }
 0x64f   : > { %v2970_v40 = vpop.f32.mrf.mxu0  ;;  %2996 = vmatpush3.bf16.msra.mxu1 %v3211_v10  ;;  %3004 = vmatpush3.bf16.msra.mxu0 %v3213_v20 }
 0x650   : > { %v2964_v51 = vpop.f32.mrf.mxu1  ;;  %2997 = vmatprep.subr.bf16.mxu1 %v3575_v8  ;;  %3005 = vmatprep.subr.bf16.mxu0 %v3575_v8 }
 0x653   : > { %2998 = vmatpush3.bf16.msra.mxu1 %v3212_v19  ;;  %3006 = vmatpush3.bf16.msra.mxu0 %v3214_v22 }
 0x654   : > { %3007 = vmatprep.subr.bf16.mxu0 %v3575_v8 }
 0x657   : > { %3008 = vmatpush3.bf16.msra.mxu0 %v3215_v34 }
 0x658   : > { %3009 = vmatprep.subr.bf16.mxu0 %v3575_v8  ;;  %v2839_v8 = vld [vmem:[%s4298_s4] ss:$0 sm:$0xff] }
 0x65b   : > { %3010 = vmatpush3.bf16.msra.mxu0 %v3216_v35 }
 0x704   : > { %v2189_v52 = vpop.f32.mrf.mxu1 }
 0x705   : > { %v2235_v53 = vpop.f32.mrf.mxu0 }
 0x706   : > { %v2975_v54 = vpop.f32.mrf.mxu1  ;;  %v2236_v60 = vadd.f32 %v2235_v53, %v2189_v52 }
 0x707   : > { %v2981_v55 = vpop.f32.mrf.mxu0 }
 0x708   : > { %v2192_v56 = vpop.f32.mrf.mxu1 }
 0x709   : > { %v2238_v57 = vpop.f32.mrf.mxu0 }
 0x70a   : > { %v2976_v58 = vpop.f32.mrf.mxu1 }
 0x70b   : > { %v2982_v59 = vpop.f32.mrf.mxu0  ;;  %v2845_v58 = vld [vmem:[%s4299_s3] ss:$0 sm:$0xff]  ;;  %s3425_s3 = sshll.u32 %s3582_s23, 4  ;;  %s3426_s3 = int_to_ptr.vmem [resolvable:$false] %s3425_s3 }
 0x70c   : > { %s3427_s10 = scalar_lea.vmem %s3426_s3, 128  ;;  %p3428_p9 = scmp.lt.s32.totalorder %s2581_s14, %s3426_s3 }
 0x70d   : > { %v2283_v61 = vpop.f32.mrf.mxu1  ;;  %v2332_v62 = vpop.f32.mrf.mxu0  ;;  %p3429_p10 = scmp.lt.s32.totalorder %s3427_s10, %s3421_s27 }
 0x70e   : > { %v2289_v63 = vadd.f32 %v2283_v61, %v2236_v60  ;;  %v2846_v60 = vld [vmem:[%s4300_s16] ss:$0 sm:$0xff] }
 0x70f   : > { %v2987_v1 = vpop.f32.mrf.mxu1  ;;  %v2993_v2 = vpop.f32.mrf.mxu0  ;;  %p3430_p3 = por %p3429_p10, %p3428_p9 }
 0x710   : > { %v2338_v3 = vadd.f32 %v2332_v62, %v2289_v63 }
 0x711   : > { %v2286_v7 = vpop.f32.mrf.mxu1  ;;  %v2335_v21 = vpop.f32.mrf.mxu0  ;;  %p3431_p6 = pnand %p3430_p3, %p3424_p8 }
 0x712   : > { %v2346_v28 = vadd.f32 %v2832_v0, %v2338_v3 }
 0x713   : > { %v2988_v9 = vpop.f32.mrf.mxu1  ;;  %v2994_v11 = vpop.f32.mrf.mxu0 }
 0x714   : > { %v2348_v12 = vadd.f32 %v2347_v4, %v2346_v28 }
 0x716   : > { %v2351_v13 = vsel %vm1469_vm4, %v2348_v12, 0.0 }
 0x717   : > { %2352 = vadd.xlane.f32.xlu0 %v2351_v13 }
 0x7a0   : > { %v2353_v14 = vpop.xlane.xlu0 %2352 }
 0x7a1   : > { %v2355_v15 = vmul.f32 0.03125, %v2353_v14 }
 0x7a3   : > { %v2356_v16 = vsub.f32 %v2348_v12, %v2355_v15 }
 0x7a5   : > { %v2357_v17 = vmul.f32 %v2356_v16, %v2356_v16 }
 0x7a7   : > { %v2358_v18 = vsel %vm1469_vm4, %v2357_v17, 0.0 }
 0x7a8   : > { %2359 = vadd.xlane.f32.xlu1 %v2358_v18 }
 0x831   : > { %v2360_v23 = vpop.xlane.xlu1 %2359 }
 0x832   : > { %v2361_v24 = vmul.f32 0.03125, %v2360_v23 }
 0x834   : > { %v2362_v25 = vadd.f32 1e-05, %v2361_v24 }
 0x836   : > { %3233 = vrsqrt.f32 %v2362_v25 }
 0x843   : > { %v3234_v26 = vpop.eup %3233 }
 0x844   : > { %v2364_v29 = vmul.f32 %v3234_v26, %v2356_v16 }
 0x846   : > { %v2371_v31 = vmul.f32 %v2833_v27, %v2364_v29 }
 0x848   : > { %v2378_v32 = vadd.f32 %v2834_v30, %v2371_v31 }
 0x84a   : > { %v2379_v33 = vpack.c.bf16 %v2378_v32, %v2378_v32 }
 0x84c   : > { %3000 = vmatmul.mubr.msk.bf16.vlgmr.msra.gmra.mxu1 %vm1469_vm4, %v2379_v33 }
 0x90c   : > { %v2440_v37 = vpop.f32.mrf.mxu1 }
 0x90d   : > { %v2441_v38 = vadd.f32 %v2835_v36, %v2440_v37 }
 0x90e   : > { %v3001_v41 = vpop.f32.mrf.mxu1 }
 0x90f   : > { %v2446_v42 = vmax.f32 %v2441_v38, 0.0 }
 0x910   : > { %v2443_v43 = vpop.f32.mrf.mxu1 }
 0x911   : > { %v2447_v44 = vpack.c.bf16 %v2446_v42, %v2446_v42 }
 0x912   : > { %v3002_v45 = vpop.f32.mrf.mxu1 }
 0x913   : > { %3012 = vmatmul.mubr.msk.bf16.vlgmr.msra.gmra.mxu0 %vm2487_vm8, %v2447_v44 }
 0x9d3   : > { %v2525_v46 = vpop.f32.mrf.mxu0 }
 0x9d4   : > { %v2526_v47 = vadd.f32 %v2839_v8, %v2525_v46 }
 0x9d5   : > { %v3013_v48 = vpop.f32.mrf.mxu0 }
 0x9d6   : > { %v2531_v49 = vadd.f32 %v2526_v47, %v2378_v32 }
 0x9d7   : > { %v2528_v50 = vpop.f32.mrf.mxu0 }
 0x9d8   : > { %v2534_v5 = vsel %vm1469_vm4, %v2531_v49, 0.0 }
 0x9d9   : > { %2535 = vadd.xlane.f32.xlu0 %v2534_v5  ;;  %v3014_v6 = vpop.f32.mrf.mxu0 }
 0xa62   : > { %v2536_v39 = vpop.xlane.xlu0 %2535 }
 0xa63   : > { %v2537_v40 = vmul.f32 0.03125, %v2536_v39 }
 0xa65   : > { %v2538_v51 = vsub.f32 %v2531_v49, %v2537_v40 }
 0xa67   : > { %v2539_v52 = vmul.f32 %v2538_v51, %v2538_v51 }
 0xa69   : > { %v2540_v53 = vsel %vm1469_vm4, %v2539_v52, 0.0 }
 0xa6a   : > { %2541 = vadd.xlane.f32.xlu1 %v2540_v53 }
 0xaf3   : > { %v2542_v54 = vpop.xlane.xlu1 %2541 }
 0xaf4   : > { %v2543_v55 = vmul.f32 0.03125, %v2542_v54 }
 0xaf6   : > { %v2544_v56 = vadd.f32 1e-05, %v2543_v55 }
 0xaf8   : > { %3235 = vrsqrt.f32 %v2544_v56 }
 0xb05   : > { %v3236_v57 = vpop.eup %3235 }
 0xb06   : > { %v2546_v59 = vmul.f32 %v3236_v57, %v2538_v51 }
 0xb08   : > { %v2553_v61 = vmul.f32 %v2845_v58, %v2546_v59 }
 0xb0a   : > { %v2560_v62 = vadd.f32 %v2846_v60, %v2553_v61 }
 0xb0c   : > { %v2561_v63 = vpack.c.bf16 %v2560_v62, %v2560_v62 }
 0xb0e   : > { %2563 = vst.msk [vmem:[%s681_s8] sm:$0xf] %vm2562_vm9, %v2561_v63 }
 0xb0f   : > { %3434 = shalt.err (!%p3431_p6)
}
 0xb10   : > { %s3435_s19 = scalar_lea.hbm %s2578_s13, 64  ;;  %s3439_s5 = scalar_lea.hbm %s4302_s2, 256 }
 0xb11   : > { %p3436_p0 = scmp.ne.s32.totalorder %s2578_s13, %s3435_s19  ;;  %p3440_p13 = scmp.lt.s32.totalorder %s2578_s13, %s4302_s2 }
 0xb12   : > { %p3441_p5 = scmp.lt.s32.totalorder %s3439_s5, %s3435_s19 }
 0xb13   : > { %p3437_p1 = pnand %p3436_p0, %p3838_p11 }
 0xb14   : > { %p3442_p2 = por %p3441_p5, %p3440_p13 }
 0xb15   : > { %p3438_p4 = pneg %p3437_p1 }
 0xb17   : > { %p3443_p7 = pnand %p3442_p2, %p3438_p4 }
 0xb19   : > { %3446 = shalt.err (!%p3443_p7)
}
 0xb1a   : > { %3041 = dma.vmem_to_hbm [thread:$0]  (%p3838_p11), %s2581_s14, 64, %s2578_s13, %s2565_s0  }
 0xb1b PF: > { %p3083_p8 = scmp.ge.s32.totalorder %s3553_s1, 2  ;;  %s2592_s15 = sand.u32 1, %s3513_s24  }
 0xb1c   : > { %s2593_s30 = scalar_lea.sflag [#allocation6], %s2592_s15 }
 0xb1d   : > { %p3067_p9 = pnand %p3083_p8, %p3852_p12 }
 0xb1f   : > { %p3068_p10 = pneg %p3067_p9 }
 0xb21   : > { %3508 = dma.done.wait (%p3068_p10), %s2593_s30, 64  }
 0xb22   : > { %3510 = vsyncadd (%p3068_p10), %s2593_s30, 4294967232  ;;  %s36_s1 = sadd.s32 1, %s3553_s1   ;;  %s4304_s30 = sld [smem:[#allocation22_spill]] }
 0xb23   : > { %p33_p3 = scmp.ge.s32.totalorder %s36_s1, 6   ;;  %s4305_s12 = sld [smem:[#allocation23_spill]] }
 0xb24   : > { %s4306_s19 = sld [smem:[#allocation24_spill]]  ;;  %s4307_s24 = smov %s3517_s25 }
 0xb25   : > { %s4308_s25 = smov %s3521_s26  ;;  %s4309_s26 = smov %s3846_s11 }
 0xb26   : > { %s4310_s27 = smov %s3529_s28  ;;  %s4311_s28 = smov %s3533_s29 }
 0xb27   : > { %s4312_s29 = smov %s3843_s6  ;;  %s4313_s0 = smov %s3545_s18 }
 0xb28   :  { %35 = sbr.rel (!%p33_p3) target bundleno = 31 (0x1f), region = 171 }
 0xb29   : > { %s4314_s18 = smov %s4305_s12 }
 0xb2d   :  { %2598 = vsyncpa [#allocation5], 1 }
 0xb2e   :  { %2600 = vsyncpa [#allocation5 + $0x1], 1 }
 0xb2f   :  { %2601 = vsyncpa [#allocation8], 1 }
 0xb30   :  { %2602 = vsyncpa [#allocation11], 1 }
 0xb31   :  { %2603 = vsyncpa [#allocation14], 1 }
 0xb32   :  { %2604 = vsyncpa [#allocation6], 1 }
 0xb33   :  { %2606 = vsyncpa [#allocation6 + $0x1], 1 }

</bundles_post_ra>
